<compile_context>
chip_gen: v5e
topology: v5e:2x2
jax: 0.10.0
libtpu: 0.0.40
codegen_flags: <defaults>
</compile_context>

<pallas_src>
import functools
import math

import jax
import jax.numpy as jnp
from jax.experimental import pallas as pl
from jax.experimental.pallas import tpu as pltpu

# ----------------------------- model config (small) -----------------------------
B = 2        # batch
N = 8        # sequence length
DIM = 32     # model dim
HEADS = 8    # attention heads (PyTorch default heads=8)
HEAD_DIM = DIM // HEADS
MLP_DIM = 64
DEPTH = 2
SCALE = DIM ** (-0.5)   # NOTE: original code scales by dim**-0.5 (not head_dim**-0.5)
LN_EPS = 1e-5

ROWS = B * N              # 16  (query rows)
COLS = HEADS * ROWS       # 128 (expanded (head, key-row) columns)


# ----------------------------- Pallas kernel -------------------------------------
def _layernorm(x, gamma, beta):
    # x: (R, D), gamma/beta: (1, D)
    mu = jnp.mean(x, axis=-1, keepdims=True)
    var = jnp.mean((x - mu) * (x - mu), axis=-1, keepdims=True)
    return (x - mu) * jax.lax.rsqrt(var + LN_EPS) * gamma + beta


def transformer_kernel(x_ref, wm_ref, w1_ref, w2_ref, vec_ref, b1_ref,
                       hmask_ref, bmask_ref, o_ref, *, depth):
    x = x_ref[...]                                    # (ROWS, DIM) f32

    for l in range(depth):
        # Constant masks (tiny; loaded at point of use, keeps live ranges short).
        hmask = hmask_ref[...]                        # (COLS, DIM)  head block mask
        bmask = bmask_ref[...]                        # (ROWS, COLS) same-batch mask

        vec = vec_ref[l]                              # (6, DIM)
        ln1g, ln1b = vec[0:1], vec[1:2]
        bout = vec[2:3]
        ln2g, ln2b = vec[3:4], vec[4:5]
        b2 = vec[5:6]

        # -------------------- attention block: x + Wo(MHA(LN(x))) --------------------
        xn = _layernorm(x, ln1g, ln1b)                                   # (16, 32)
        # q columns already carry the attention scale (folded at pack time).
        q = jnp.dot(xn, wm_ref[l, 0], preferred_element_type=jnp.float32)
        k = jnp.dot(xn, wm_ref[l, 1], preferred_element_type=jnp.float32)
        v = jnp.dot(xn, wm_ref[l, 2], preferred_element_type=jnp.float32)

        # Head-replicated, head-masked K and V: row c = h*ROWS + j holds k[j]/v[j]
        # restricted to head h's 4 feature lanes (block-diagonal structure).
        k_se = jnp.concatenate([k] * HEADS, axis=0) * hmask              # (128, 32)
        v_se = jnp.concatenate([v] * HEADS, axis=0) * hmask              # (128, 32)

        # One dense contraction gives every per-head QK^T at once:
        #   s[i, h*ROWS + j] = sum_d q[i, h*hd+d] * k[j, h*hd+d]
        s = jax.lax.dot_general(q, k_se, (((1,), (1,)), ((), ())),
                                preferred_element_type=jnp.float32)      # (16, 128)

        # Masked softmax on the 128-wide lane axis (shift-invariant: a per-row max
        # is as exact as a per-head max; cross-batch columns are zeroed after exp).
        s = s - jnp.max(s, axis=-1, keepdims=True)
        e = jnp.exp(s) * bmask                                           # (16, 128)

        # Numerator (already head-concatenated) and per-(row, head) denominator,
        # each as one dense lane-wide matmul; exact division (no approx reciprocal).
        numer = jnp.dot(e, v_se, preferred_element_type=jnp.float32)     # (16, 32)
        denom = jnp.dot(e, hmask, preferred_element_type=jnp.float32)    # (16, 32)
        out = numer / denom

        y = jnp.dot(out, wm_ref[l, 3], preferred_element_type=jnp.float32) + bout
        x = x + y                                                        # residual

        # -------------------- feedforward block: x + FF(LN(x)) --------------------
        xn = _layernorm(x, ln2g, ln2b)
        h1 = jnp.dot(xn, w1_ref[l], preferred_element_type=jnp.float32) + b1_ref[l]
        # exact GELU (PyTorch nn.GELU default erf form)
        h1 = 0.5 * h1 * (1.0 + jax.lax.erf(h1 * (1.0 / math.sqrt(2.0))))
        y = jnp.dot(h1, w2_ref[l], preferred_element_type=jnp.float32) + b2
        x = x + y                                                        # residual

    o_ref[...] = x.astype(o_ref.dtype)


# ----------------------------- parameter / mask packing ---------------------------
def pack_params(layers):
    wm, w1, w2, vec, b1 = [], [], [], [], []
    for layer in layers:
        a, f = layer["attn"], layer["ff"]
        wq = a["wqkv"][:, :DIM] * SCALE        # fold attention scale into q weights
        wk = a["wqkv"][:, DIM:2 * DIM]
        wv = a["wqkv"][:, 2 * DIM:]
        wm.append(jnp.stack([wq, wk, wv, a["wout"]], axis=0))            # (4, D, D)
        w1.append(f["w1"])
        w2.append(f["w2"])
        vec.append(jnp.concatenate([a["gamma"], a["beta"], a["bout"],
                                    f["gamma"], f["beta"], f["b2"]], axis=0))  # (6, D)
        b1.append(f["b1"])
    return (jnp.stack(wm),    # (DEPTH, 4, D, D)
            jnp.stack(w1),    # (DEPTH, D, MLP)
            jnp.stack(w2),    # (DEPTH, MLP, D)
            jnp.stack(vec),   # (DEPTH, 6, D)
            jnp.stack(b1))    # (DEPTH, 1, MLP)


def make_masks():
    c = jnp.arange(COLS)
    d = jnp.arange(DIM)
    i = jnp.arange(ROWS)
    # head mask (COLS, DIM): column group h = c // ROWS owns output lanes [h*hd, (h+1)*hd)
    hmask = ((c[:, None] // ROWS) == (d[None, :] // HEAD_DIM)).astype(jnp.float32)
    # batch mask (ROWS, COLS): query row i attends to column c iff same batch
    bmask = ((i[:, None] // N) == ((c[None, :] % ROWS) // N)).astype(jnp.float32)
    return hmask, bmask


# ----------------------------- wrapper --------------------------------------------
def transformer_forward(x, layers):
    # mirrors Transformer.forward: for attn, ff in self.layers: x = attn(x); x = ff(x)
    b, n, d = x.shape
    wm, w1, w2, vec, b1 = pack_params(layers)
    hmask, bmask = make_masks()
    x2d = x.reshape(b * n, d)                 # free HBM reshape; lane-dense store

    kernel = functools.partial(transformer_kernel, depth=DEPTH)
    vmem_spec = pl.BlockSpec(memory_space=pltpu.MemorySpace.VMEM)
    out2d = pl.pallas_call(
        kernel,
        out_shape=jax.ShapeDtypeStruct((b * n, d), x.dtype),
        in_specs=[vmem_spec] * 8,
        out_specs=vmem_spec,
    )(x2d, wm, w1, w2, vec, b1, hmask, bmask)
    return out2d.reshape(b, n, d)


# ----------------------------- deterministic params ------------------------------
def init_params(key):
    layers = []
    for _ in range(DEPTH):
        keys = jax.random.split(key, 8)
        key = keys[-1]
        attn_p = {
            "gamma": jnp.ones((1, DIM), jnp.float32),
            "beta": jnp.zeros((1, DIM), jnp.float32),
            "wqkv": 0.05 * jax.random.normal(keys[0], (DIM, 3 * DIM), jnp.float32),
            "wout": 0.05 * jax.random.normal(keys[1], (DIM, DIM), jnp.float32),
            "bout": 0.01 * jax.random.normal(keys[2], (1, DIM), jnp.float32),
        }
        ff_p = {
            "gamma": jnp.ones((1, DIM), jnp.float32),
            "beta": jnp.zeros((1, DIM), jnp.float32),
            "w1": 0.05 * jax.random.normal(keys[3], (DIM, MLP_DIM), jnp.float32),
            "b1": 0.01 * jax.random.normal(keys[4], (1, MLP_DIM), jnp.float32),
            "w2": 0.05 * jax.random.normal(keys[5], (MLP_DIM, DIM), jnp.float32),
            "b2": 0.01 * jax.random.normal(keys[6], (1, DIM), jnp.float32),
        }
        layers.append({"attn": attn_p, "ff": ff_p})
    return layers


# ----------------------------- pure-JAX reference ---------------------------------
def _ln_ref(x, g, b):
    mu = x.mean(-1, keepdims=True)
    var = ((x - mu) ** 2).mean(-1, keepdims=True)
    return (x - mu) / jnp.sqrt(var + LN_EPS) * g + b


def _ref_forward(x, layers):
    for layer in layers:
        p = layer["attn"]
        xn = _ln_ref(x, p["gamma"], p["beta"])
        qkv = xn @ p["wqkv"]                                        # (B,N,3D)
        qkv = qkv.reshape(B, N, 3, HEADS, HEAD_DIM).transpose(2, 0, 3, 1, 4)
        q, k, v = qkv[0], qkv[1], qkv[2]                            # (B,H,N,d)
        dots = jnp.einsum("bhid,bhjd->bhij", q, k) * SCALE
        attn = jax.nn.softmax(dots, axis=-1)
        out = jnp.einsum("bhij,bhjd->bhid", attn, v)
        out = out.transpose(0, 2, 1, 3).reshape(B, N, DIM)
        x = out @ p["wout"] + p["bout"] + x

        p = layer["ff"]
        xn = _ln_ref(x, p["gamma"], p["beta"])
        h = xn @ p["w1"] + p["b1"]
        h = 0.5 * h * (1.0 + jax.lax.erf(h / jnp.sqrt(2.0)))
        x = h @ p["w2"] + p["b2"] + x
    return x


# ----------------------------------- main ------------------------------------------
if __name__ == "__main__":
    key = jax.random.PRNGKey(0)
    k_x, k_p = jax.random.split(key)
    x = jax.random.normal(k_x, (B, N, DIM), jnp.float32)
    layers = init_params(k_p)

    out = transformer_forward(x, layers)
    out = jax.block_until_ready(out)

    ref = _ref_forward(x, layers)
    assert out.shape == (B, N, DIM)
    # Tighter than before: softmax now uses exact division (no approx reciprocal).
    assert jnp.allclose(out, ref, atol=1e-4, rtol=1e-4), float(jnp.max(jnp.abs(out - ref)))

    print("KERNEL_OK")
</pallas_src>

<mosaic_0001>
module attributes {stable_mosaic.version = 11 : i64} {
  func.func @transformer_kernel(%arg0: memref<16x32xf32, #tpu.memory_space<vmem>>, %arg1: memref<2x4x32x32xf32, #tpu.memory_space<vmem>>, %arg2: memref<2x32x64xf32, #tpu.memory_space<vmem>>, %arg3: memref<2x64x32xf32, #tpu.memory_space<vmem>>, %arg4: memref<2x6x32xf32, #tpu.memory_space<vmem>>, %arg5: memref<2x1x64xf32, #tpu.memory_space<vmem>>, %arg6: memref<128x32xf32, #tpu.memory_space<vmem>>, %arg7: memref<16x128xf32, #tpu.memory_space<vmem>>, %arg8: memref<16x32xf32, #tpu.memory_space<vmem>>) attributes {dimension_semantics = [], scalar_prefetch = 0 : i64, scratch_operands = 0 : i64, tpu.core_type = #tpu.core_type<tc>} {
    %c0 = arith.constant 0 : index
    %c0_0 = arith.constant 0 : index
    %0 = vector.load %arg0[%c0, %c0_0] : memref<16x32xf32, #tpu.memory_space<vmem>>, vector<16x32xf32>
    %c0_1 = arith.constant 0 : index
    %c0_2 = arith.constant 0 : index
    %1 = vector.load %arg6[%c0_1, %c0_2] : memref<128x32xf32, #tpu.memory_space<vmem>>, vector<128x32xf32>
    %c0_3 = arith.constant 0 : index
    %c0_4 = arith.constant 0 : index
    %2 = vector.load %arg7[%c0_3, %c0_4] : memref<16x128xf32, #tpu.memory_space<vmem>>, vector<16x128xf32>
    %c0_5 = arith.constant 0 : index
    %c0_6 = arith.constant 0 : index
    %c0_7 = arith.constant 0 : index
    %3 = vector.load %arg4[%c0_5, %c0_6, %c0_7] : memref<2x6x32xf32, #tpu.memory_space<vmem>>, vector<1x6x32xf32>
    %4 = vector.shape_cast %3 : vector<1x6x32xf32> to vector<6x32xf32>
    %5 = vector.extract_strided_slice %4 {offsets = [0, 0], sizes = [1, 32], strides = [1, 1]} : vector<6x32xf32> to vector<1x32xf32>
    %6 = vector.extract_strided_slice %4 {offsets = [1, 0], sizes = [1, 32], strides = [1, 1]} : vector<6x32xf32> to vector<1x32xf32>
    %7 = vector.extract_strided_slice %4 {offsets = [2, 0], sizes = [1, 32], strides = [1, 1]} : vector<6x32xf32> to vector<1x32xf32>
    %8 = vector.extract_strided_slice %4 {offsets = [3, 0], sizes = [1, 32], strides = [1, 1]} : vector<6x32xf32> to vector<1x32xf32>
    %9 = vector.extract_strided_slice %4 {offsets = [4, 0], sizes = [1, 32], strides = [1, 1]} : vector<6x32xf32> to vector<1x32xf32>
    %10 = vector.extract_strided_slice %4 {offsets = [5, 0], sizes = [1, 32], strides = [1, 1]} : vector<6x32xf32> to vector<1x32xf32>
    %cst = arith.constant dense<0.000000e+00> : vector<16xf32>
    %11 = vector.multi_reduction <add>, %0, %cst [1] : vector<16x32xf32> to vector<16xf32>
    %12 = vector.shape_cast %11 : vector<16xf32> to vector<16x1xf32>
    %cst_8 = arith.constant 3.200000e+01 : f32
    %13 = vector.broadcast %cst_8 : f32 to vector<16x1xf32>
    %14 = arith.divf %12, %13 : vector<16x1xf32>
    %15 = vector.broadcast %14 : vector<16x1xf32> to vector<16x32xf32>
    %16 = arith.subf %0, %15 : vector<16x32xf32>
    %17 = vector.broadcast %14 : vector<16x1xf32> to vector<16x32xf32>
    %18 = arith.subf %0, %17 : vector<16x32xf32>
    %19 = arith.mulf %16, %18 : vector<16x32xf32>
    %cst_9 = arith.constant dense<0.000000e+00> : vector<16xf32>
    %20 = vector.multi_reduction <add>, %19, %cst_9 [1] : vector<16x32xf32> to vector<16xf32>
    %21 = vector.shape_cast %20 : vector<16xf32> to vector<16x1xf32>
    %cst_10 = arith.constant 3.200000e+01 : f32
    %22 = vector.broadcast %cst_10 : f32 to vector<16x1xf32>
    %23 = arith.divf %21, %22 : vector<16x1xf32>
    %24 = vector.broadcast %14 : vector<16x1xf32> to vector<16x32xf32>
    %25 = arith.subf %0, %24 : vector<16x32xf32>
    %cst_11 = arith.constant 9.99999974E-6 : f32
    %26 = vector.broadcast %cst_11 : f32 to vector<16x1xf32>
    %27 = arith.addf %23, %26 : vector<16x1xf32>
    %28 = math.rsqrt %27 : vector<16x1xf32>
    %29 = vector.broadcast %28 : vector<16x1xf32> to vector<16x32xf32>
    %30 = arith.mulf %25, %29 : vector<16x32xf32>
    %31 = vector.broadcast %5 : vector<1x32xf32> to vector<16x32xf32>
    %32 = arith.mulf %30, %31 : vector<16x32xf32>
    %33 = vector.broadcast %6 : vector<1x32xf32> to vector<16x32xf32>
    %34 = arith.addf %32, %33 : vector<16x32xf32>
    %c0_12 = arith.constant 0 : index
    %c0_13 = arith.constant 0 : index
    %c0_14 = arith.constant 0 : index
    %c0_15 = arith.constant 0 : index
    %35 = vector.load %arg1[%c0_12, %c0_13, %c0_14, %c0_15] : memref<2x4x32x32xf32, #tpu.memory_space<vmem>>, vector<1x1x32x32xf32>
    %36 = vector.shape_cast %35 : vector<1x1x32x32xf32> to vector<32x32xf32>
    %cst_16 = arith.constant dense<0.000000e+00> : vector<16x32xf32>
    %37 = tpu.matmul %34, %36, %cst_16 {dimension_numbers = #tpu.dot_dimension_numbers<[1], [0], [0], [1], [0, 0, 1, 1], [], []>} : vector<16x32xf32>, vector<32x32xf32>, vector<16x32xf32> -> vector<16x32xf32>
    %c0_17 = arith.constant 0 : index
    %c1 = arith.constant 1 : index
    %c0_18 = arith.constant 0 : index
    %c0_19 = arith.constant 0 : index
    %38 = vector.load %arg1[%c0_17, %c1, %c0_18, %c0_19] : memref<2x4x32x32xf32, #tpu.memory_space<vmem>>, vector<1x1x32x32xf32>
    %39 = vector.shape_cast %38 : vector<1x1x32x32xf32> to vector<32x32xf32>
    %cst_20 = arith.constant dense<0.000000e+00> : vector<16x32xf32>
    %40 = tpu.matmul %34, %39, %cst_20 {dimension_numbers = #tpu.dot_dimension_numbers<[1], [0], [0], [1], [0, 0, 1, 1], [], []>} : vector<16x32xf32>, vector<32x32xf32>, vector<16x32xf32> -> vector<16x32xf32>
    %c0_21 = arith.constant 0 : index
    %c2 = arith.constant 2 : index
    %c0_22 = arith.constant 0 : index
    %c0_23 = arith.constant 0 : index
    %41 = vector.load %arg1[%c0_21, %c2, %c0_22, %c0_23] : memref<2x4x32x32xf32, #tpu.memory_space<vmem>>, vector<1x1x32x32xf32>
    %42 = vector.shape_cast %41 : vector<1x1x32x32xf32> to vector<32x32xf32>
    %cst_24 = arith.constant dense<0.000000e+00> : vector<16x32xf32>
    %43 = tpu.matmul %34, %42, %cst_24 {dimension_numbers = #tpu.dot_dimension_numbers<[1], [0], [0], [1], [0, 0, 1, 1], [], []>} : vector<16x32xf32>, vector<32x32xf32>, vector<16x32xf32> -> vector<16x32xf32>
    %44 = tpu.concatenate %40, %40, %40, %40, %40, %40, %40, %40 in 0 : vector<16x32xf32>, vector<16x32xf32>, vector<16x32xf32>, vector<16x32xf32>, vector<16x32xf32>, vector<16x32xf32>, vector<16x32xf32>, vector<16x32xf32> -> vector<128x32xf32>
    %45 = arith.mulf %44, %1 : vector<128x32xf32>
    %46 = tpu.concatenate %43, %43, %43, %43, %43, %43, %43, %43 in 0 : vector<16x32xf32>, vector<16x32xf32>, vector<16x32xf32>, vector<16x32xf32>, vector<16x32xf32>, vector<16x32xf32>, vector<16x32xf32>, vector<16x32xf32> -> vector<128x32xf32>
    %47 = arith.mulf %46, %1 : vector<128x32xf32>
    %cst_25 = arith.constant dense<0.000000e+00> : vector<16x128xf32>
    %48 = tpu.matmul %37, %45, %cst_25 {dimension_numbers = #tpu.dot_dimension_numbers<[1], [1], [0], [0], [0, 0, 1, 0], [], []>} : vector<16x32xf32>, vector<128x32xf32>, vector<16x128xf32> -> vector<16x128xf32>
    %cst_26 = arith.constant dense<0xFF800000> : vector<16xf32>
    %49 = vector.multi_reduction <maximumf>, %48, %cst_26 [1] : vector<16x128xf32> to vector<16xf32>
    %50 = vector.shape_cast %49 : vector<16xf32> to vector<16x1xf32>
    %51 = vector.broadcast %50 : vector<16x1xf32> to vector<16x128xf32>
    %52 = arith.subf %48, %51 : vector<16x128xf32>
    %53 = math.exp %52 : vector<16x128xf32>
    %54 = arith.mulf %53, %2 : vector<16x128xf32>
    %cst_27 = arith.constant dense<0.000000e+00> : vector<16x32xf32>
    %55 = tpu.matmul %54, %47, %cst_27 {dimension_numbers = #tpu.dot_dimension_numbers<[1], [0], [0], [1], [0, 0, 1, 1], [], []>} : vector<16x128xf32>, vector<128x32xf32>, vector<16x32xf32> -> vector<16x32xf32>
    %cst_28 = arith.constant dense<0.000000e+00> : vector<16x32xf32>
    %56 = tpu.matmul %54, %1, %cst_28 {dimension_numbers = #tpu.dot_dimension_numbers<[1], [0], [0], [1], [0, 0, 1, 1], [], []>} : vector<16x128xf32>, vector<128x32xf32>, vector<16x32xf32> -> vector<16x32xf32>
    %57 = arith.divf %55, %56 : vector<16x32xf32>
    %c0_29 = arith.constant 0 : index
    %c3 = arith.constant 3 : index
    %c0_30 = arith.constant 0 : index
    %c0_31 = arith.constant 0 : index
    %58 = vector.load %arg1[%c0_29, %c3, %c0_30, %c0_31] : memref<2x4x32x32xf32, #tpu.memory_space<vmem>>, vector<1x1x32x32xf32>
    %59 = vector.shape_cast %58 : vector<1x1x32x32xf32> to vector<32x32xf32>
    %cst_32 = arith.constant dense<0.000000e+00> : vector<16x32xf32>
    %60 = tpu.matmul %57, %59, %cst_32 {dimension_numbers = #tpu.dot_dimension_numbers<[1], [0], [0], [1], [0, 0, 1, 1], [], []>} : vector<16x32xf32>, vector<32x32xf32>, vector<16x32xf32> -> vector<16x32xf32>
    %61 = vector.broadcast %7 : vector<1x32xf32> to vector<16x32xf32>
    %62 = arith.addf %60, %61 : vector<16x32xf32>
    %63 = arith.addf %0, %62 : vector<16x32xf32>
    %cst_33 = arith.constant dense<0.000000e+00> : vector<16xf32>
    %64 = vector.multi_reduction <add>, %63, %cst_33 [1] : vector<16x32xf32> to vector<16xf32>
    %65 = vector.shape_cast %64 : vector<16xf32> to vector<16x1xf32>
    %cst_34 = arith.constant 3.200000e+01 : f32
    %66 = vector.broadcast %cst_34 : f32 to vector<16x1xf32>
    %67 = arith.divf %65, %66 : vector<16x1xf32>
    %68 = vector.broadcast %67 : vector<16x1xf32> to vector<16x32xf32>
    %69 = arith.subf %63, %68 : vector<16x32xf32>
    %70 = vector.broadcast %67 : vector<16x1xf32> to vector<16x32xf32>
    %71 = arith.subf %63, %70 : vector<16x32xf32>
    %72 = arith.mulf %69, %71 : vector<16x32xf32>
    %cst_35 = arith.constant dense<0.000000e+00> : vector<16xf32>
    %73 = vector.multi_reduction <add>, %72, %cst_35 [1] : vector<16x32xf32> to vector<16xf32>
    %74 = vector.shape_cast %73 : vector<16xf32> to vector<16x1xf32>
    %cst_36 = arith.constant 3.200000e+01 : f32
    %75 = vector.broadcast %cst_36 : f32 to vector<16x1xf32>
    %76 = arith.divf %74, %75 : vector<16x1xf32>
    %77 = vector.broadcast %67 : vector<16x1xf32> to vector<16x32xf32>
    %78 = arith.subf %63, %77 : vector<16x32xf32>
    %cst_37 = arith.constant 9.99999974E-6 : f32
    %79 = vector.broadcast %cst_37 : f32 to vector<16x1xf32>
    %80 = arith.addf %76, %79 : vector<16x1xf32>
    %81 = math.rsqrt %80 : vector<16x1xf32>
    %82 = vector.broadcast %81 : vector<16x1xf32> to vector<16x32xf32>
    %83 = arith.mulf %78, %82 : vector<16x32xf32>
    %84 = vector.broadcast %8 : vector<1x32xf32> to vector<16x32xf32>
    %85 = arith.mulf %83, %84 : vector<16x32xf32>
    %86 = vector.broadcast %9 : vector<1x32xf32> to vector<16x32xf32>
    %87 = arith.addf %85, %86 : vector<16x32xf32>
    %c0_38 = arith.constant 0 : index
    %c0_39 = arith.constant 0 : index
    %c0_40 = arith.constant 0 : index
    %88 = vector.load %arg2[%c0_38, %c0_39, %c0_40] : memref<2x32x64xf32, #tpu.memory_space<vmem>>, vector<1x32x64xf32>
    %89 = vector.shape_cast %88 : vector<1x32x64xf32> to vector<32x64xf32>
    %cst_41 = arith.constant dense<0.000000e+00> : vector<16x64xf32>
    %90 = tpu.matmul %87, %89, %cst_41 {dimension_numbers = #tpu.dot_dimension_numbers<[1], [0], [0], [1], [0, 0, 1, 1], [], []>} : vector<16x32xf32>, vector<32x64xf32>, vector<16x64xf32> -> vector<16x64xf32>
    %c0_42 = arith.constant 0 : index
    %c0_43 = arith.constant 0 : index
    %c0_44 = arith.constant 0 : index
    %91 = vector.load %arg5[%c0_42, %c0_43, %c0_44] : memref<2x1x64xf32, #tpu.memory_space<vmem>>, vector<1x1x64xf32>
    %92 = vector.shape_cast %91 : vector<1x1x64xf32> to vector<1x64xf32>
    %93 = vector.broadcast %92 : vector<1x64xf32> to vector<16x64xf32>
    %94 = arith.addf %90, %93 : vector<16x64xf32>
    %cst_45 = arith.constant 5.000000e-01 : f32
    %95 = vector.broadcast %cst_45 : f32 to vector<16x64xf32>
    %96 = arith.mulf %95, %94 : vector<16x64xf32>
    %cst_46 = arith.constant 0.707106769 : f32
    %97 = vector.broadcast %cst_46 : f32 to vector<16x64xf32>
    %98 = arith.mulf %94, %97 : vector<16x64xf32>
    %99 = math.erf %98 : vector<16x64xf32>
    %cst_47 = arith.constant 1.000000e+00 : f32
    %100 = vector.broadcast %cst_47 : f32 to vector<16x64xf32>
    %101 = arith.addf %100, %99 : vector<16x64xf32>
    %102 = arith.mulf %96, %101 : vector<16x64xf32>
    %c0_48 = arith.constant 0 : index
    %c0_49 = arith.constant 0 : index
    %c0_50 = arith.constant 0 : index
    %103 = vector.load %arg3[%c0_48, %c0_49, %c0_50] : memref<2x64x32xf32, #tpu.memory_space<vmem>>, vector<1x64x32xf32>
    %104 = vector.shape_cast %103 : vector<1x64x32xf32> to vector<64x32xf32>
    %cst_51 = arith.constant dense<0.000000e+00> : vector<16x32xf32>
    %105 = tpu.matmul %102, %104, %cst_51 {dimension_numbers = #tpu.dot_dimension_numbers<[1], [0], [0], [1], [0, 0, 1, 1], [], []>} : vector<16x64xf32>, vector<64x32xf32>, vector<16x32xf32> -> vector<16x32xf32>
    %106 = vector.broadcast %10 : vector<1x32xf32> to vector<16x32xf32>
    %107 = arith.addf %105, %106 : vector<16x32xf32>
    %108 = arith.addf %63, %107 : vector<16x32xf32>
    %c0_52 = arith.constant 0 : index
    %c0_53 = arith.constant 0 : index
    %109 = vector.load %arg6[%c0_52, %c0_53] : memref<128x32xf32, #tpu.memory_space<vmem>>, vector<128x32xf32>
    %c0_54 = arith.constant 0 : index
    %c0_55 = arith.constant 0 : index
    %110 = vector.load %arg7[%c0_54, %c0_55] : memref<16x128xf32, #tpu.memory_space<vmem>>, vector<16x128xf32>
    %c1_56 = arith.constant 1 : index
    %c0_57 = arith.constant 0 : index
    %c0_58 = arith.constant 0 : index
    %111 = vector.load %arg4[%c1_56, %c0_57, %c0_58] : memref<2x6x32xf32, #tpu.memory_space<vmem>>, vector<1x6x32xf32>
    %112 = vector.shape_cast %111 : vector<1x6x32xf32> to vector<6x32xf32>
    %113 = vector.extract_strided_slice %112 {offsets = [0, 0], sizes = [1, 32], strides = [1, 1]} : vector<6x32xf32> to vector<1x32xf32>
    %114 = vector.extract_strided_slice %112 {offsets = [1, 0], sizes = [1, 32], strides = [1, 1]} : vector<6x32xf32> to vector<1x32xf32>
    %115 = vector.extract_strided_slice %112 {offsets = [2, 0], sizes = [1, 32], strides = [1, 1]} : vector<6x32xf32> to vector<1x32xf32>
    %116 = vector.extract_strided_slice %112 {offsets = [3, 0], sizes = [1, 32], strides = [1, 1]} : vector<6x32xf32> to vector<1x32xf32>
    %117 = vector.extract_strided_slice %112 {offsets = [4, 0], sizes = [1, 32], strides = [1, 1]} : vector<6x32xf32> to vector<1x32xf32>
    %118 = vector.extract_strided_slice %112 {offsets = [5, 0], sizes = [1, 32], strides = [1, 1]} : vector<6x32xf32> to vector<1x32xf32>
    %cst_59 = arith.constant dense<0.000000e+00> : vector<16xf32>
    %119 = vector.multi_reduction <add>, %108, %cst_59 [1] : vector<16x32xf32> to vector<16xf32>
    %120 = vector.shape_cast %119 : vector<16xf32> to vector<16x1xf32>
    %cst_60 = arith.constant 3.200000e+01 : f32
    %121 = vector.broadcast %cst_60 : f32 to vector<16x1xf32>
    %122 = arith.divf %120, %121 : vector<16x1xf32>
    %123 = vector.broadcast %122 : vector<16x1xf32> to vector<16x32xf32>
    %124 = arith.subf %108, %123 : vector<16x32xf32>
    %125 = vector.broadcast %122 : vector<16x1xf32> to vector<16x32xf32>
    %126 = arith.subf %108, %125 : vector<16x32xf32>
    %127 = arith.mulf %124, %126 : vector<16x32xf32>
    %cst_61 = arith.constant dense<0.000000e+00> : vector<16xf32>
    %128 = vector.multi_reduction <add>, %127, %cst_61 [1] : vector<16x32xf32> to vector<16xf32>
    %129 = vector.shape_cast %128 : vector<16xf32> to vector<16x1xf32>
    %cst_62 = arith.constant 3.200000e+01 : f32
    %130 = vector.broadcast %cst_62 : f32 to vector<16x1xf32>
    %131 = arith.divf %129, %130 : vector<16x1xf32>
    %132 = vector.broadcast %122 : vector<16x1xf32> to vector<16x32xf32>
    %133 = arith.subf %108, %132 : vector<16x32xf32>
    %cst_63 = arith.constant 9.99999974E-6 : f32
    %134 = vector.broadcast %cst_63 : f32 to vector<16x1xf32>
    %135 = arith.addf %131, %134 : vector<16x1xf32>
    %136 = math.rsqrt %135 : vector<16x1xf32>
    %137 = vector.broadcast %136 : vector<16x1xf32> to vector<16x32xf32>
    %138 = arith.mulf %133, %137 : vector<16x32xf32>
    %139 = vector.broadcast %113 : vector<1x32xf32> to vector<16x32xf32>
    %140 = arith.mulf %138, %139 : vector<16x32xf32>
    %141 = vector.broadcast %114 : vector<1x32xf32> to vector<16x32xf32>
    %142 = arith.addf %140, %141 : vector<16x32xf32>
    %c1_64 = arith.constant 1 : index
    %c0_65 = arith.constant 0 : index
    %c0_66 = arith.constant 0 : index
    %c0_67 = arith.constant 0 : index
    %143 = vector.load %arg1[%c1_64, %c0_65, %c0_66, %c0_67] : memref<2x4x32x32xf32, #tpu.memory_space<vmem>>, vector<1x1x32x32xf32>
    %144 = vector.shape_cast %143 : vector<1x1x32x32xf32> to vector<32x32xf32>
    %cst_68 = arith.constant dense<0.000000e+00> : vector<16x32xf32>
    %145 = tpu.matmul %142, %144, %cst_68 {dimension_numbers = #tpu.dot_dimension_numbers<[1], [0], [0], [1], [0, 0, 1, 1], [], []>} : vector<16x32xf32>, vector<32x32xf32>, vector<16x32xf32> -> vector<16x32xf32>
    %c1_69 = arith.constant 1 : index
    %c1_70 = arith.constant 1 : index
    %c0_71 = arith.constant 0 : index
    %c0_72 = arith.constant 0 : index
    %146 = vector.load %arg1[%c1_69, %c1_70, %c0_71, %c0_72] : memref<2x4x32x32xf32, #tpu.memory_space<vmem>>, vector<1x1x32x32xf32>
    %147 = vector.shape_cast %146 : vector<1x1x32x32xf32> to vector<32x32xf32>
    %cst_73 = arith.constant dense<0.000000e+00> : vector<16x32xf32>
    %148 = tpu.matmul %142, %147, %cst_73 {dimension_numbers = #tpu.dot_dimension_numbers<[1], [0], [0], [1], [0, 0, 1, 1], [], []>} : vector<16x32xf32>, vector<32x32xf32>, vector<16x32xf32> -> vector<16x32xf32>
    %c1_74 = arith.constant 1 : index
    %c2_75 = arith.constant 2 : index
    %c0_76 = arith.constant 0 : index
    %c0_77 = arith.constant 0 : index
    %149 = vector.load %arg1[%c1_74, %c2_75, %c0_76, %c0_77] : memref<2x4x32x32xf32, #tpu.memory_space<vmem>>, vector<1x1x32x32xf32>
    %150 = vector.shape_cast %149 : vector<1x1x32x32xf32> to vector<32x32xf32>
    %cst_78 = arith.constant dense<0.000000e+00> : vector<16x32xf32>
    %151 = tpu.matmul %142, %150, %cst_78 {dimension_numbers = #tpu.dot_dimension_numbers<[1], [0], [0], [1], [0, 0, 1, 1], [], []>} : vector<16x32xf32>, vector<32x32xf32>, vector<16x32xf32> -> vector<16x32xf32>
    %152 = tpu.concatenate %148, %148, %148, %148, %148, %148, %148, %148 in 0 : vector<16x32xf32>, vector<16x32xf32>, vector<16x32xf32>, vector<16x32xf32>, vector<16x32xf32>, vector<16x32xf32>, vector<16x32xf32>, vector<16x32xf32> -> vector<128x32xf32>
    %153 = arith.mulf %152, %109 : vector<128x32xf32>
    %154 = tpu.concatenate %151, %151, %151, %151, %151, %151, %151, %151 in 0 : vector<16x32xf32>, vector<16x32xf32>, vector<16x32xf32>, vector<16x32xf32>, vector<16x32xf32>, vector<16x32xf32>, vector<16x32xf32>, vector<16x32xf32> -> vector<128x32xf32>
    %155 = arith.mulf %154, %109 : vector<128x32xf32>
    %cst_79 = arith.constant dense<0.000000e+00> : vector<16x128xf32>
    %156 = tpu.matmul %145, %153, %cst_79 {dimension_numbers = #tpu.dot_dimension_numbers<[1], [1], [0], [0], [0, 0, 1, 0], [], []>} : vector<16x32xf32>, vector<128x32xf32>, vector<16x128xf32> -> vector<16x128xf32>
    %cst_80 = arith.constant dense<0xFF800000> : vector<16xf32>
    %157 = vector.multi_reduction <maximumf>, %156, %cst_80 [1] : vector<16x128xf32> to vector<16xf32>
    %158 = vector.shape_cast %157 : vector<16xf32> to vector<16x1xf32>
    %159 = vector.broadcast %158 : vector<16x1xf32> to vector<16x128xf32>
    %160 = arith.subf %156, %159 : vector<16x128xf32>
    %161 = math.exp %160 : vector<16x128xf32>
    %162 = arith.mulf %161, %110 : vector<16x128xf32>
    %cst_81 = arith.constant dense<0.000000e+00> : vector<16x32xf32>
    %163 = tpu.matmul %162, %155, %cst_81 {dimension_numbers = #tpu.dot_dimension_numbers<[1], [0], [0], [1], [0, 0, 1, 1], [], []>} : vector<16x128xf32>, vector<128x32xf32>, vector<16x32xf32> -> vector<16x32xf32>
    %cst_82 = arith.constant dense<0.000000e+00> : vector<16x32xf32>
    %164 = tpu.matmul %162, %109, %cst_82 {dimension_numbers = #tpu.dot_dimension_numbers<[1], [0], [0], [1], [0, 0, 1, 1], [], []>} : vector<16x128xf32>, vector<128x32xf32>, vector<16x32xf32> -> vector<16x32xf32>
    %165 = arith.divf %163, %164 : vector<16x32xf32>
    %c1_83 = arith.constant 1 : index
    %c3_84 = arith.constant 3 : index
    %c0_85 = arith.constant 0 : index
    %c0_86 = arith.constant 0 : index
    %166 = vector.load %arg1[%c1_83, %c3_84, %c0_85, %c0_86] : memref<2x4x32x32xf32, #tpu.memory_space<vmem>>, vector<1x1x32x32xf32>
    %167 = vector.shape_cast %166 : vector<1x1x32x32xf32> to vector<32x32xf32>
    %cst_87 = arith.constant dense<0.000000e+00> : vector<16x32xf32>
    %168 = tpu.matmul %165, %167, %cst_87 {dimension_numbers = #tpu.dot_dimension_numbers<[1], [0], [0], [1], [0, 0, 1, 1], [], []>} : vector<16x32xf32>, vector<32x32xf32>, vector<16x32xf32> -> vector<16x32xf32>
    %169 = vector.broadcast %115 : vector<1x32xf32> to vector<16x32xf32>
    %170 = arith.addf %168, %169 : vector<16x32xf32>
    %171 = arith.addf %108, %170 : vector<16x32xf32>
    %cst_88 = arith.constant dense<0.000000e+00> : vector<16xf32>
    %172 = vector.multi_reduction <add>, %171, %cst_88 [1] : vector<16x32xf32> to vector<16xf32>
    %173 = vector.shape_cast %172 : vector<16xf32> to vector<16x1xf32>
    %cst_89 = arith.constant 3.200000e+01 : f32
    %174 = vector.broadcast %cst_89 : f32 to vector<16x1xf32>
    %175 = arith.divf %173, %174 : vector<16x1xf32>
    %176 = vector.broadcast %175 : vector<16x1xf32> to vector<16x32xf32>
    %177 = arith.subf %171, %176 : vector<16x32xf32>
    %178 = vector.broadcast %175 : vector<16x1xf32> to vector<16x32xf32>
    %179 = arith.subf %171, %178 : vector<16x32xf32>
    %180 = arith.mulf %177, %179 : vector<16x32xf32>
    %cst_90 = arith.constant dense<0.000000e+00> : vector<16xf32>
    %181 = vector.multi_reduction <add>, %180, %cst_90 [1] : vector<16x32xf32> to vector<16xf32>
    %182 = vector.shape_cast %181 : vector<16xf32> to vector<16x1xf32>
    %cst_91 = arith.constant 3.200000e+01 : f32
    %183 = vector.broadcast %cst_91 : f32 to vector<16x1xf32>
    %184 = arith.divf %182, %183 : vector<16x1xf32>
    %185 = vector.broadcast %175 : vector<16x1xf32> to vector<16x32xf32>
    %186 = arith.subf %171, %185 : vector<16x32xf32>
    %cst_92 = arith.constant 9.99999974E-6 : f32
    %187 = vector.broadcast %cst_92 : f32 to vector<16x1xf32>
    %188 = arith.addf %184, %187 : vector<16x1xf32>
    %189 = math.rsqrt %188 : vector<16x1xf32>
    %190 = vector.broadcast %189 : vector<16x1xf32> to vector<16x32xf32>
    %191 = arith.mulf %186, %190 : vector<16x32xf32>
    %192 = vector.broadcast %116 : vector<1x32xf32> to vector<16x32xf32>
    %193 = arith.mulf %191, %192 : vector<16x32xf32>
    %194 = vector.broadcast %117 : vector<1x32xf32> to vector<16x32xf32>
    %195 = arith.addf %193, %194 : vector<16x32xf32>
    %c1_93 = arith.constant 1 : index
    %c0_94 = arith.constant 0 : index
    %c0_95 = arith.constant 0 : index
    %196 = vector.load %arg2[%c1_93, %c0_94, %c0_95] : memref<2x32x64xf32, #tpu.memory_space<vmem>>, vector<1x32x64xf32>
    %197 = vector.shape_cast %196 : vector<1x32x64xf32> to vector<32x64xf32>
    %cst_96 = arith.constant dense<0.000000e+00> : vector<16x64xf32>
    %198 = tpu.matmul %195, %197, %cst_96 {dimension_numbers = #tpu.dot_dimension_numbers<[1], [0], [0], [1], [0, 0, 1, 1], [], []>} : vector<16x32xf32>, vector<32x64xf32>, vector<16x64xf32> -> vector<16x64xf32>
    %c1_97 = arith.constant 1 : index
    %c0_98 = arith.constant 0 : index
    %c0_99 = arith.constant 0 : index
    %199 = vector.load %arg5[%c1_97, %c0_98, %c0_99] : memref<2x1x64xf32, #tpu.memory_space<vmem>>, vector<1x1x64xf32>
    %200 = vector.shape_cast %199 : vector<1x1x64xf32> to vector<1x64xf32>
    %201 = vector.broadcast %200 : vector<1x64xf32> to vector<16x64xf32>
    %202 = arith.addf %198, %201 : vector<16x64xf32>
    %cst_100 = arith.constant 5.000000e-01 : f32
    %203 = vector.broadcast %cst_100 : f32 to vector<16x64xf32>
    %204 = arith.mulf %203, %202 : vector<16x64xf32>
    %cst_101 = arith.constant 0.707106769 : f32
    %205 = vector.broadcast %cst_101 : f32 to vector<16x64xf32>
    %206 = arith.mulf %202, %205 : vector<16x64xf32>
    %207 = math.erf %206 : vector<16x64xf32>
    %cst_102 = arith.constant 1.000000e+00 : f32
    %208 = vector.broadcast %cst_102 : f32 to vector<16x64xf32>
    %209 = arith.addf %208, %207 : vector<16x64xf32>
    %210 = arith.mulf %204, %209 : vector<16x64xf32>
    %c1_103 = arith.constant 1 : index
    %c0_104 = arith.constant 0 : index
    %c0_105 = arith.constant 0 : index
    %211 = vector.load %arg3[%c1_103, %c0_104, %c0_105] : memref<2x64x32xf32, #tpu.memory_space<vmem>>, vector<1x64x32xf32>
    %212 = vector.shape_cast %211 : vector<1x64x32xf32> to vector<64x32xf32>
    %cst_106 = arith.constant dense<0.000000e+00> : vector<16x32xf32>
    %213 = tpu.matmul %210, %212, %cst_106 {dimension_numbers = #tpu.dot_dimension_numbers<[1], [0], [0], [1], [0, 0, 1, 1], [], []>} : vector<16x64xf32>, vector<64x32xf32>, vector<16x32xf32> -> vector<16x32xf32>
    %214 = vector.broadcast %118 : vector<1x32xf32> to vector<16x32xf32>
    %215 = arith.addf %213, %214 : vector<16x32xf32>
    %216 = arith.addf %171, %215 : vector<16x32xf32>
    %c0_107 = arith.constant 0 : index
    %c0_108 = arith.constant 0 : index
    %217 = vector.load %arg8[%c0_107, %c0_108] : memref<16x32xf32, #tpu.memory_space<vmem>>, vector<16x32xf32>
    tpu.vector_store %arg8[%c0_107, %c0_108], %216 {strides = array<i32>} : memref<16x32xf32, #tpu.memory_space<vmem>>, vector<16x32xf32>,
    return
  }
}

</mosaic_0001>

<bundles_post_ra>
// kernel: tpu_custom_call.1
= control target key start
LH: loop header
LB: loop body
LE: loop exit
PB: predicated region body
PF: predicated region fallthrough
CT: control target
= control target key end

     0   :  { %13 = vsyncpa [#allocation3], 0  ;;  %s2143_s0 = inlined_call_operand.vmem [shape: f32[16,32], index: 0, kind: input, shape index: {}]   ;;  %s2144_s1 = inlined_call_operand.vmem [shape: f32[2,4,32,32], index: 1, kind: input, shape index: {}]   ;;  %s2145_s2 = inlined_call_operand.vmem [shape: f32[2,32,64], index: 2, kind: input, shape index: {}]   ;;  %s2146_s3 = inlined_call_operand.vmem [shape: f32[2,64,32], index: 3, kind: input, shape index: {}]   ;;  %s2147_s4 = inlined_call_operand.vmem [shape: f32[2,6,32], index: 4, kind: input, shape index: {}]   ;;  %s2148_s5 = inlined_call_operand.hbm [shape: f32[2,1,64], index: 5, kind: input, shape index: {}]   ;;  %s2149_s6 = inlined_call_operand.vmem [shape: f32[128,32], index: 6, kind: input, shape index: {}]   ;;  %s2150_s7 = inlined_call_operand.vmem [shape: f32[16,128], index: 7, kind: input, shape index: {}]   ;;  %s2151_s8 = inlined_call_operand.hbm [shape: f32[16,32], index: 8, kind: output, shape index: {}]  }
   0x1   :  { %14 = vsyncpa [#allocation4], 0  ;;  %s29_s29 = sshll.u32 %s2148_s5, 4  ;;  %s1487_s30 = smov [#allocation2]   ;;  %s30_s29 = int_to_ptr.hbm [resolvable:$true] %s29_s29 }
   0x2   :  { %s31_s9 = sshll.u32 %s1487_s30, 4  ;;  %s1488_s10 = smov 16   ;;  %s32_s9 = int_to_ptr.vmem [resolvable:$true] %s31_s9 }
   0x3   :  { %s1489_s11 = smov 1  }
   0x4   :  { %37 = dma.hbm_to_vmem [thread:$0]  %s30_s29, 32, %s32_s9, [#allocation3], %s1488_s10, %s1488_s10, %s1489_s11  }
   0x5   :  { %1483 = dma.done.wait [#allocation3], 32  }
   0x6   :  { %1484 = vsyncadd [#allocation3], 4294967264  ;;  %vm67_vm0 = vcmask 261120   ;;  %v1545_v0 = vld [vmem:[%s2143_s0] sm:$0xff]  ;;  %v1552_v2 = vld [vmem:[%s2143_s0 + $0x8] sm:$0xff]  ;;  %v1490_v4 = vmov 32.0  }
   0x7   :  { %v68_v1 = vsel %vm67_vm0, %v1545_v0, 0.0  ;;  %v71_v3 = vsel %vm67_vm0, %v1552_v2, 0.0  ;;  %1393 = vrcp.f32 %v1490_v4  ;;  %v128_v21 = vld [vmem:[%s2144_s1 + $0x18] sm:$0xff]  ;;  %v127_v24 = vld [vmem:[%s2144_s1 + $0x10] sm:$0xff]  ;;  %v126_v27 = vld [vmem:[%s2144_s1 + $0x8] sm:$0xff]  ;;  %s1266_s14 = sshll.u32 %s2151_s8, 4  ;;  %s1267_s14 = int_to_ptr.hbm [resolvable:$true] %s1266_s14 }
   0x8   :  { %69 = vadd.xlane.f32.xlu0 %v68_v1  ;;  %v1284_v22 = vld [vmem:[%s2144_s1 + $0x38] sm:$0xff]  ;;  %147 = vmatpush.msra.mxu0 %v128_v21  ;;  %v1283_v25 = vld [vmem:[%s2144_s1 + $0x30] sm:$0xff]  ;;  %v1282_v28 = vld [vmem:[%s2144_s1 + $0x28] sm:$0xff]  ;;  %s1492_s0 = smov 128  }
   0x9   :  { %v1290_v23 = vld [vmem:[%s2144_s1 + $0x58] sm:$0xff]  ;;  %175 = vmatpush.msra.mxu3 %v1284_v22  ;;  %v1289_v26 = vld [vmem:[%s2144_s1 + $0x50] sm:$0xff]  ;;  %v1288_v29 = vld [vmem:[%s2144_s1 + $0x48] sm:$0xff] }
   0xa   :  { %203 = vmatpush.msra.mxu2 %v1290_v23  ;;  %148 = vmatpush.msra.mxu0 %v127_v24  ;;  %v125_v30 = vld [vmem:[%s2144_s1] sm:$0xff]  ;;  %v1623_v62 = vld [vmem:[%s2149_s6 + $0x78] sm:$0xff]  ;;  %v1629_v63 = vld [vmem:[%s2149_s6 + $0x70] sm:$0xff] }
   0xb   :  { %176 = vmatpush.msra.mxu3 %v1283_v25  ;;  %v1281_v31 = vld [vmem:[%s2144_s1 + $0x20] sm:$0xff]  ;;  %358 = vmatpush.msra.mxu1 %v1623_v62  ;;  %v1635_v1 = vld [vmem:[%s2149_s6 + $0x68] sm:$0xff]  ;;  %v1647_v4 = vld [vmem:[%s2149_s6 + $0x58] sm:$0xff] }
   0xc   :  { %204 = vmatpush.msra.mxu2 %v1289_v26  ;;  %149 = vmatpush.msra.mxu0 %v126_v27  ;;  %v1287_v32 = vld [vmem:[%s2144_s1 + $0x40] sm:$0xff] }
   0xd   :  { %v1394_v5 = vpop.eup %1393  ;;  %177 = vmatpush.msra.mxu3 %v1282_v28  ;;  %v1609_v44 = vld [vmem:[%s2147_s4] sm:$0x3f]  ;;  %359 = vmatpush.msra.mxu1 %v1629_v63 }
   0xe   :  { %v75_v6 = vmul.f32 32.0, %v1394_v5  ;;  %vm79_vm1 = vweird.f32 %v1394_v5  ;;  %205 = vmatpush.msra.mxu2 %v1288_v29  ;;  %150 = vmatpush.msra.mxu0 %v125_v30  ;;  %v119_v48 = vperm.slane %v1609_v44, 0  ;;  %v122_v52 = vperm.slane %v1609_v44, 1 }
   0xf   :  { %178 = vmatpush.msra.mxu3 %v1281_v31  ;;  %360 = vmatpush.msra.mxu1 %v1635_v1 }
  0x10   :  { %72 = vadd.xlane.f32.xlu0 %v71_v3  ;;  %v76_v7 = vsub.f32 1.0, %v75_v6  ;;  %206 = vmatpush.msra.mxu2 %v1287_v32  ;;  %v1641_v3 = vld [vmem:[%s2149_s6 + $0x60] sm:$0xff]  ;;  %v1659_v6 = vld [vmem:[%s2149_s6 + $0x48] sm:$0xff] }
  0x11   :  { %361 = vmatpush.msra.mxu1 %v1641_v3 }
  0x12   :  { %v77_v8 = vmul.f32 %v1394_v5, %v76_v7  ;;  %v1665_v7 = vld [vmem:[%s2149_s6 + $0x40] sm:$0xff] }
  0x13   :  { %362 = vmatpush.msra.mxu1 %v1647_v4 }
  0x14   :  { %v78_v9 = vadd.f32 %v1394_v5, %v77_v8  ;;  %v1671_v8 = vld [vmem:[%s2149_s6 + $0x38] sm:$0xff] }
  0x16   :  { %v1556_v10 = vsel %vm79_vm1, %v1394_v5, %v78_v9  ;;  %v1653_v5 = vld [vmem:[%s2149_s6 + $0x50] sm:$0xff] }
  0x17   :  { %363 = vmatpush.msra.mxu1 %v1653_v5  ;;  %v1677_v9 = vld [vmem:[%s2149_s6 + $0x30] sm:$0xff] }
  0x19   :  { %364 = vmatpush.msra.mxu1 %v1659_v6 }
  0x1b   :  { %365 = vmatpush.msra.mxu1 %v1665_v7 }
  0x1d   :  { %366 = vmatpush.msra.mxu1 %v1671_v8 }
  0x1f   :  { %367 = vmatpush.msra.mxu1 %v1677_v9 }
  0x7b   :  { %v70_v11 = vpop.xlane.xlu0 %69 }
  0x7c   :  { %v81_v12 = vmul.f32 %v1556_v10, %v70_v11  ;;  %v1683_v11 = vld [vmem:[%s2149_s6 + $0x28] sm:$0xff] }
  0x7d   :  { %368 = vmatpush.msra.mxu1 %v1683_v11 }
  0x7e   :  { %v83_v13 = vsub.f32 %v1545_v0, %v81_v12  ;;  %v1689_v12 = vld [vmem:[%s2149_s6 + $0x20] sm:$0xff] }
  0x7f   :  { %369 = vmatpush.msra.mxu1 %v1689_v12 }
  0x80   :  { %v85_v14 = vmul.f32 %v83_v13, %v83_v13 }
  0x82   :  { %v87_v15 = vsel %vm67_vm0, %v85_v14, 0.0 }
  0x83   :  { %88 = vadd.xlane.f32.xlu1 %v87_v15  ;;  %v73_v16 = vpop.xlane.xlu0 %72  ;;  %v1697_v15 = vld [vmem:[%s2149_s6 + $0x18] sm:$0xff] }
  0x84   :  { %v82_v17 = vmul.f32 %v1556_v10, %v73_v16  ;;  %370 = vmatpush.msra.mxu1 %v1697_v15  ;;  %v1703_v16 = vld [vmem:[%s2149_s6 + $0x10] sm:$0xff] }
  0x86   :  { %v1563_v18 = vsub.f32 %v1552_v2, %v82_v17  ;;  %371 = vmatpush.msra.mxu1 %v1703_v16  ;;  %v1709_v17 = vld [vmem:[%s2149_s6 + $0x8] sm:$0xff] }
  0x88   :  { %v86_v19 = vmul.f32 %v1563_v18, %v1563_v18  ;;  %372 = vmatpush.msra.mxu1 %v1709_v17 }
  0x8a   :  { %v90_v20 = vsel %vm67_vm0, %v86_v19, 0.0 }
  0x8b   :  { %91 = vadd.xlane.f32.xlu1 %v90_v20 }
  0xf6   :  { %v89_v33 = vpop.xlane.xlu1 %88 }
  0xf7   :  { %v93_v34 = vmul.f32 %v89_v33, %v1556_v10 }
  0xf9   :  { %v95_v35 = vadd.f32 1e-05, %v93_v34 }
  0xfb   :  { %1395 = vrsqrt.f32 %v95_v35  ;;  %vm103_vm3 = vweird.f32 %v95_v35 }
  0xfe   :  { %v92_v36 = vpop.xlane.xlu1 %91 }
  0xff   :  { %v94_v37 = vmul.f32 %v92_v36, %v1556_v10 }
 0x101   :  { %v1396_v38 = vpop.eup %1395  ;;  %v96_v39 = vadd.f32 1e-05, %v94_v37 }
 0x102   :  { %v98_v40 = vmul.f32 %v1396_v38, %v95_v35  ;;  %vm104_vm2 = vweird.f32 %v1396_v38 }
 0x103   :  { %1397 = vrsqrt.f32 %v96_v39  ;;  %vm105_vm4 = vmor %vm103_vm3, %vm104_vm2  ;;  %vm113_vm6 = vweird.f32 %v96_v39 }
 0x104   :  { %v99_v41 = vmul.f32 %v1396_v38, %v98_v40 }
 0x106   :  { %v100_v42 = vmul.f32 0.5, %v99_v41 }
 0x108   :  { %v101_v43 = vsub.f32 1.5, %v100_v42 }
 0x109   :  { %v1398_v45 = vpop.eup %1397 }
 0x10a   :  { %v102_v46 = vmul.f32 %v1396_v38, %v101_v43  ;;  %v108_v47 = vmul.f32 %v1398_v45, %v96_v39  ;;  %vm114_vm5 = vweird.f32 %v1398_v45 }
 0x10b   :  { %vm115_vm7 = vmor %vm113_vm6, %vm114_vm5 }
 0x10c   :  { %v106_v49 = vsel %vm105_vm4, %v1396_v38, %v102_v46  ;;  %v109_v50 = vmul.f32 %v1398_v45, %v108_v47 }
 0x10d   :  { %v117_v51 = vmul.f32 %v106_v49, %v83_v13 }
 0x10e   :  { %v110_v53 = vmul.f32 0.5, %v109_v50 }
 0x10f   :  { %v120_v54 = vmul.f32 %v119_v48, %v117_v51 }
 0x110   :  { %v111_v55 = vsub.f32 1.5, %v110_v53 }
 0x111   :  { %v123_v56 = vadd.f32 %v122_v52, %v120_v54 }
 0x112   :  { %v112_v57 = vmul.f32 %v1398_v45, %v111_v55 }
 0x113   :  { %1279 = vmatmul.msk.f32.vlgmr.msra.gmra.mxu0 %vm67_vm0, %v123_v56  ;;  %1285 = vmatmul.msk.f32.vlgmr.msra.gmra.mxu3 %vm67_vm0, %v123_v56 }
 0x114   :  { %v116_v58 = vsel %vm115_vm7, %v1398_v45, %v112_v57  ;;  %1291 = vmatmul.msk.f32.vlgmr.msra.gmra.mxu2 %vm67_vm0, %v123_v56 }
 0x115   :  { %v118_v59 = vmul.f32 %v116_v58, %v1563_v18  ;;  %v1715_v18 = vld [vmem:[%s2149_s6] sm:$0xff] }
 0x116   :  { %373 = vmatpush.msra.mxu1 %v1715_v18 }
 0x117   :  { %v121_v60 = vmul.f32 %v119_v48, %v118_v59 }
 0x119   :  { %v124_v61 = vadd.f32 %v122_v52, %v121_v60 }
 0x11b   :  { %1280 = vmatmul.msk.f32.gmra.mxu0 %vm67_vm0, %v124_v61  ;;  %1286 = vmatmul.msk.f32.gmra.mxu3 %vm67_vm0, %v124_v61 }
 0x11c   :  { %1292 = vmatmul.msk.f32.gmra.mxu2 %vm67_vm0, %v124_v61 }
 0x190   :  { %v152_v54 = vpop.f32.mrf.mxu0 }
 0x196   :  { %v1691_v13 = vpop.f32.mrf.mxu3 }
 0x197   :  { %v208_v14 = vpop.f32.mrf.mxu2  ;;  %v228_v24 = vmul.f32 %v1691_v13, %v1629_v63  ;;  %v226_v30 = vmul.f32 %v1691_v13, %v1641_v3  ;;  %v224_v36 = vmul.f32 %v1691_v13, %v1653_v5  ;;  %v222_v42 = vmul.f32 %v1691_v13, %v1665_v7 }
 0x198   :  { %v244_v23 = vmul.f32 %v208_v14, %v1629_v63  ;;  %v242_v26 = vmul.f32 %v208_v14, %v1641_v3  ;;  %v240_v29 = vmul.f32 %v208_v14, %v1653_v5  ;;  %v238_v32 = vmul.f32 %v208_v14, %v1665_v7  ;;  %v155_v55 = vpop.f32.mrf.mxu0 }
 0x199   :  { %v236_v35 = vmul.f32 %v208_v14, %v1677_v9  ;;  %v234_v38 = vmul.f32 %v208_v14, %v1689_v12  ;;  %v232_v41 = vmul.f32 %v208_v14, %v1703_v16  ;;  %v230_v45 = vmul.f32 %v208_v14, %v1715_v18  ;;  %v1805_v14 = vld [vmem:[%s2150_s7] sm:$0xff] }
 0x19a   :  { %v220_v47 = vmul.f32 %v1691_v13, %v1677_v9  ;;  %v218_v49 = vmul.f32 %v1691_v13, %v1689_v12  ;;  %v216_v51 = vmul.f32 %v1691_v13, %v1703_v16  ;;  %v214_v53 = vmul.f32 %v1691_v13, %v1715_v18 }
 0x19e   :  { %v1717_v19 = vpop.f32.mrf.mxu3 }
 0x19f   :  { %v211_v20 = vpop.f32.mrf.mxu2  ;;  %v229_v21 = vmul.f32 %v1717_v19, %v1623_v62  ;;  %v227_v27 = vmul.f32 %v1717_v19, %v1635_v1  ;;  %v225_v33 = vmul.f32 %v1717_v19, %v1647_v4  ;;  %v223_v39 = vmul.f32 %v1717_v19, %v1659_v6 }
 0x1a0   :  { %v245_v22 = vmul.f32 %v211_v20, %v1623_v62  ;;  %v243_v25 = vmul.f32 %v211_v20, %v1635_v1  ;;  %v241_v28 = vmul.f32 %v211_v20, %v1647_v4  ;;  %v239_v31 = vmul.f32 %v211_v20, %v1659_v6 }
 0x1a1   :  { %1293 = vmatpush.xpose.msk.msrb.mxu3 %vm67_vm0, %v229_v21  ;;  %v237_v34 = vmul.f32 %v211_v20, %v1671_v8  ;;  %v235_v37 = vmul.f32 %v211_v20, %v1683_v11  ;;  %v233_v40 = vmul.f32 %v211_v20, %v1697_v15  ;;  %v231_v43 = vmul.f32 %v211_v20, %v1709_v17 }
 0x1a2   :  { %335 = vmatpush.msrb.mxu0 %v245_v22  ;;  %v221_v46 = vmul.f32 %v1717_v19, %v1671_v8  ;;  %v219_v48 = vmul.f32 %v1717_v19, %v1683_v11  ;;  %v217_v50 = vmul.f32 %v1717_v19, %v1697_v15  ;;  %v215_v52 = vmul.f32 %v1717_v19, %v1709_v17  ;;  %v1811_v22 = vld [vmem:[%s2150_s7 + $0x8] sm:$0xff] }
 0x1a4   :  { %336 = vmatpush.msrb.mxu0 %v244_v23 }
 0x1a5   :  { %1294 = vmatpush.xpose.msk.msrb.mxu3 %vm67_vm0, %v228_v24 }
 0x1a6   :  { %337 = vmatpush.msrb.mxu0 %v243_v25  ;;  %v1314_v25 = vld [vmem:[%s2144_s1 + $0x78] sm:$0xff] }
 0x1a7   :  { %435 = vmatpush.msrb.mxu2 %v1314_v25 }
 0x1a8   :  { %338 = vmatpush.msrb.mxu0 %v242_v26  ;;  %v1313_v26 = vld [vmem:[%s2144_s1 + $0x70] sm:$0xff] }
 0x1a9   :  { %1295 = vmatpush.xpose.msk.msrb.mxu3 %vm67_vm0, %v227_v27  ;;  %436 = vmatpush.msrb.mxu2 %v1313_v26  ;;  %v1312_v27 = vld [vmem:[%s2144_s1 + $0x68] sm:$0xff] }
 0x1aa   :  { %339 = vmatpush.msrb.mxu0 %v241_v28  ;;  %v1311_v28 = vld [vmem:[%s2144_s1 + $0x60] sm:$0xff] }
 0x1ab   :  { %437 = vmatpush.msrb.mxu2 %v1312_v27 }
 0x1ac   :  { %340 = vmatpush.msrb.mxu0 %v240_v29 }
 0x1ad   :  { %1296 = vmatpush.xpose.msk.msrb.mxu3 %vm67_vm0, %v226_v30  ;;  %438 = vmatpush.msrb.mxu2 %v1311_v28 }
 0x1ae   :  { %341 = vmatpush.msrb.mxu0 %v239_v31 }
 0x1b0   :  { %342 = vmatpush.msrb.mxu0 %v238_v32 }
 0x1b1   :  { %1297 = vmatpush.xpose.msk.msrb.mxu3 %vm67_vm0, %v225_v33 }
 0x1b2   :  { %343 = vmatpush.msrb.mxu0 %v237_v34 }
 0x1b4   :  { %344 = vmatpush.msrb.mxu0 %v236_v35 }
 0x1b5   :  { %1298 = vmatpush.xpose.msk.msrb.mxu3 %vm67_vm0, %v224_v36 }
 0x1b6   :  { %345 = vmatpush.msrb.mxu0 %v235_v37 }
 0x1b8   :  { %346 = vmatpush.msrb.mxu0 %v234_v38 }
 0x1b9   :  { %1299 = vmatpush.xpose.msk.msrb.mxu3 %vm67_vm0, %v223_v39 }
 0x1ba   :  { %347 = vmatpush.msrb.mxu0 %v233_v40 }
 0x1bc   :  { %348 = vmatpush.msrb.mxu0 %v232_v41 }
 0x1bd   :  { %1300 = vmatpush.xpose.msk.msrb.mxu3 %vm67_vm0, %v222_v42 }
 0x1be   :  { %349 = vmatpush.msrb.mxu0 %v231_v43 }
 0x1c0   :  { %350 = vmatpush.msrb.mxu0 %v230_v45 }
 0x1c1   :  { %1301 = vmatpush.xpose.msk.msrb.mxu3 %vm67_vm0, %v221_v46 }
 0x1c5   :  { %1302 = vmatpush.xpose.msk.msrb.mxu3 %vm67_vm0, %v220_v47 }
 0x1c9   :  { %1303 = vmatpush.xpose.msk.msrb.mxu3 %vm67_vm0, %v219_v48 }
 0x1cd   :  { %1304 = vmatpush.xpose.msk.msrb.mxu3 %vm67_vm0, %v218_v49 }
 0x1d1   :  { %1305 = vmatpush.xpose.msk.msrb.mxu3 %vm67_vm0, %v217_v50 }
 0x1d5   :  { %1306 = vmatpush.xpose.msk.msrb.mxu3 %vm67_vm0, %v216_v51 }
 0x1d9   :  { %1307 = vmatpush.xpose.msk.msrb.mxu3 %vm67_vm0, %v215_v52 }
 0x1dd   :  { %1308 = vmatpush.xpose.msk.msrb.mxu3 %vm67_vm0, %v214_v53 }
 0x1e0   :  { %1309 = vmatmul.msk.f32.vlgmr.msrb.gmra.mxu3 %vm67_vm0, %v152_v54 }
 0x1e1   :  { %950 = vmatpush.msra.mxu3 %v1623_v62 }
 0x1e3   :  { %951 = vmatpush.msra.mxu3 %v1629_v63 }
 0x1e5   :  { %952 = vmatpush.msra.mxu3 %v1635_v1 }
 0x1e7   :  { %953 = vmatpush.msra.mxu3 %v1641_v3 }
 0x1e8   :  { %1310 = vmatmul.msk.f32.gmra.mxu3 %vm67_vm0, %v155_v55 }
 0x1e9   :  { %954 = vmatpush.msra.mxu3 %v1647_v4 }
 0x1eb   :  { %955 = vmatpush.msra.mxu3 %v1653_v5 }
 0x1ed   :  { %956 = vmatpush.msra.mxu3 %v1659_v6 }
 0x1ef   :  { %957 = vmatpush.msra.mxu3 %v1665_v7 }
 0x1f1   :  { %958 = vmatpush.msra.mxu3 %v1671_v8 }
 0x1f3   :  { %959 = vmatpush.msra.mxu3 %v1677_v9 }
 0x1f5   :  { %960 = vmatpush.msra.mxu3 %v1683_v11 }
 0x1f7   :  { %961 = vmatpush.msra.mxu3 %v1689_v12 }
 0x1f9   :  { %962 = vmatpush.msra.mxu3 %v1697_v15 }
 0x1fb   :  { %963 = vmatpush.msra.mxu3 %v1703_v16 }
 0x1fd   :  { %964 = vmatpush.msra.mxu3 %v1709_v17 }
 0x1ff   :  { %965 = vmatpush.msra.mxu3 %v1715_v18 }
 0x263   :  { %v317_v56 = vpop.f32.mrf.mxu3 }
 0x264   :  { %323 = vmax.xlane.f32.xlu2 %v317_v56 }
 0x26b   :  { %v320_v57 = vpop.f32.mrf.mxu3 }
 0x26c   :  { %325 = vmax.xlane.f32.xlu2 %v320_v57 }
 0x2d7   :  { %v324_v58 = vpop.xlane.xlu2 %323 }
 0x2d8   :  { %v327_v59 = vsub.f32 %v317_v56, %v324_v58  ;;  %v416_v56 = vperm.slane %v1609_v44, 2 }
 0x2da   :  { %v329_v60 = vmul.f32 1.442695, %v327_v59 }
 0x2dc   :  { %1399 = vpow2.f32 %v329_v60 }
 0x2df   :  { %v326_v61 = vpop.xlane.xlu2 %325 }
 0x2e0   :  { %v328_v13 = vsub.f32 %v320_v57, %v326_v61 }
 0x2e2   :  { %v1400_v19 = vpop.eup %1399  ;;  %v331_v20 = vmul.f32 1.442695, %v328_v13 }
 0x2e3   :  { %v333_v21 = vmul.f32 %v1400_v19, %v1805_v14 }
 0x2e4   :  { %1401 = vpow2.f32 %v331_v20 }
 0x2e5   :  { %351 = vmatmul.f32.vlgmr.msrb.gmra.mxu0 %v333_v21  ;;  %374 = vmatmul.f32.vlgmr.msra.gmra.mxu1 %v333_v21 }
 0x2ea   :  { %v1402_v23 = vpop.eup %1401 }
 0x2eb   :  { %v334_v24 = vmul.f32 %v1402_v23, %v1811_v22 }
 0x2ed   :  { %354 = vmatmul.f32.gmra.mxu0 %v334_v24  ;;  %377 = vmatmul.f32.gmra.mxu1 %v334_v24 }
 0x362   :  { %v375_v29 = vpop.f32.mrf.mxu1  ;;  %v352_v39 = vpop.f32.mrf.mxu0 }
 0x363   :  { %1403 = vrcp.f32 %v375_v29  ;;  %v392_v34 = vand.u32 2147483648, %v375_v29  ;;  %v390_v36 = vand.u32 2147483647, %v375_v29  ;;  %vm386_vm9 = vweird.f32 %v375_v29 }
 0x365   :  { %v393_v40 = vor.u32 1.1754944e-38, %v392_v34  ;;  %vm391_vm11 = vcmp.eq.f32.partialorder %v390_v36, 8.507059e+37 }
 0x369   :  { %v1404_v30 = vpop.eup %1403 }
 0x36a   :  { %v382_v31 = vmul.f32 %v1404_v30, %v375_v29  ;;  %v378_v32 = vpop.f32.mrf.mxu1  ;;  %vm387_vm8 = vweird.f32 %v1404_v30  ;;  %v355_v53 = vpop.f32.mrf.mxu0 }
 0x36b   :  { %1405 = vrcp.f32 %v378_v32  ;;  %vm388_vm10 = vmor %vm386_vm9, %vm387_vm8  ;;  %v407_v47 = vand.u32 2147483648, %v378_v32  ;;  %v405_v49 = vand.u32 2147483647, %v378_v32  ;;  %vm401_vm13 = vweird.f32 %v378_v32 }
 0x36c   :  { %v383_v33 = vsub.f32 1.0, %v382_v31  ;;  %v500_v31 = vld [vmem:[%s2145_s2 + $0x10] sm:$0xff] }
 0x36d   :  { %v408_v51 = vor.u32 1.1754944e-38, %v407_v47  ;;  %vm406_vm15 = vcmp.eq.f32.partialorder %v405_v49, 8.507059e+37  ;;  %v492_v49 = vperm.slane %v1609_v44, 3 }
 0x36e   :  { %v384_v35 = vmul.f32 %v1404_v30, %v383_v33  ;;  %v498_v33 = vld [vmem:[%s2145_s2] sm:$0xff] }
 0x370   :  { %v385_v37 = vadd.f32 %v1404_v30, %v384_v35 }
 0x371   :  { %v1406_v38 = vpop.eup %1405 }
 0x372   :  { %v397_v41 = vmul.f32 %v1406_v38, %v378_v32  ;;  %v389_v42 = vsel %vm388_vm10, %v1404_v30, %v385_v37  ;;  %vm402_vm12 = vweird.f32 %v1406_v38  ;;  %v501_v30 = vld [vmem:[%s2145_s2 + $0x18] sm:$0xff]  ;;  %v499_v32 = vld [vmem:[%s2145_s2 + $0x8] sm:$0xff] }
 0x373   :  { %v394_v43 = vsel %vm391_vm11, %v393_v40, %v389_v42  ;;  %vm403_vm14 = vmor %vm401_vm13, %vm402_vm12  ;;  %524 = vmatpush.msra.mxu2 %v501_v30  ;;  %vm632_vm13 = vcmask 523264  }
 0x374   :  { %v398_v45 = vsub.f32 1.0, %v397_v41  ;;  %v395_v46 = vmul.f32 %v394_v43, %v352_v39 }
 0x375   :  { %525 = vmatpush.msra.mxu2 %v500_v31 }
 0x376   :  { %v399_v48 = vmul.f32 %v1406_v38, %v398_v45  ;;  %1315 = vmatmul.msk.f32.vlgmr.msrb.gmra.mxu2 %vm67_vm0, %v395_v46 }
 0x377   :  { %526 = vmatpush.msra.mxu2 %v499_v32 }
 0x378   :  { %v400_v50 = vadd.f32 %v1406_v38, %v399_v48 }
 0x379   :  { %527 = vmatpush.msra.mxu2 %v498_v33  ;;  %v629_v33 = vld [vmem:[%s2146_s3 + $0x30] sm:$0xff] }
 0x37a   :  { %v404_v52 = vsel %vm403_vm14, %v1406_v38, %v400_v50 }
 0x37b   :  { %v409_v54 = vsel %vm406_vm15, %v408_v51, %v404_v52 }
 0x37c   :  { %v410_v55 = vmul.f32 %v409_v54, %v355_v53  ;;  %v495_v53 = vperm.slane %v1609_v44, 4 }
 0x37e   :  { %1316 = vmatmul.msk.f32.gmra.mxu2 %vm67_vm0, %v410_v55 }
 0x3f9   :  { %v440_v57 = vpop.f32.mrf.mxu2 }
 0x3fa   :  { %v441_v58 = vadd.f32 %v440_v57, %v416_v56 }
 0x3fc   :  { %v1830_v59 = vadd.f32 %v441_v58, %v1545_v0 }
 0x3fe   :  { %v448_v60 = vsel %vm67_vm0, %v1830_v59, 0.0 }
 0x3ff   :  { %449 = vadd.xlane.f32.xlu0 %v448_v60 }
 0x401   :  { %v443_v61 = vpop.f32.mrf.mxu2 }
 0x402   :  { %v444_v13 = vadd.f32 %v443_v61, %v416_v56 }
 0x404   :  { %v1835_v19 = vadd.f32 %v444_v13, %v1552_v2 }
 0x406   :  { %v451_v20 = vsel %vm67_vm0, %v1835_v19, 0.0 }
 0x407   :  { %452 = vadd.xlane.f32.xlu1 %v451_v20 }
 0x472   :  { %v450_v21 = vpop.xlane.xlu0 %449 }
 0x473   :  { %v454_v23 = vmul.f32 %v450_v21, %v1556_v10  ;;  %v1391_v21 = vld [vmem:[#allocation2] ss:$0 sm:$0xff] }
 0x475   :  { %v456_v24 = vsub.f32 %v1830_v59, %v454_v23 }
 0x477   :  { %v458_v0 = vmul.f32 %v456_v24, %v456_v24 }
 0x479   :  { %v460_v25 = vsel %vm67_vm0, %v458_v0, 0.0 }
 0x47a   :  { %461 = vadd.xlane.f32.xlu2 %v460_v25  ;;  %v453_v26 = vpop.xlane.xlu1 %452 }
 0x47b   :  { %v455_v27 = vmul.f32 %v453_v26, %v1556_v10 }
 0x47d   :  { %v457_v28 = vsub.f32 %v1835_v19, %v455_v27 }
 0x47f   :  { %v459_v2 = vmul.f32 %v457_v28, %v457_v28 }
 0x481   :  { %v463_v29 = vsel %vm67_vm0, %v459_v2, 0.0 }
 0x482   :  { %464 = vadd.xlane.f32.xlu0 %v463_v29 }
 0x4ed   :  { %v462_v34 = vpop.xlane.xlu2 %461 }
 0x4ee   :  { %v466_v35 = vmul.f32 %v462_v34, %v1556_v10 }
 0x4f0   :  { %v468_v36 = vadd.f32 1e-05, %v466_v35 }
 0x4f2   :  { %1407 = vrsqrt.f32 %v468_v36  ;;  %vm476_vm2 = vweird.f32 %v468_v36 }
 0x4f5   :  { %v465_v37 = vpop.xlane.xlu0 %464 }
 0x4f6   :  { %v467_v38 = vmul.f32 %v465_v37, %v1556_v10  ;;  %v628_v37 = vld [vmem:[%s2146_s3 + $0x28] sm:$0xff] }
 0x4f8   :  { %v1408_v39 = vpop.eup %1407  ;;  %v469_v40 = vadd.f32 1e-05, %v467_v38 }
 0x4f9   :  { %v471_v41 = vmul.f32 %v1408_v39, %v468_v36  ;;  %vm477_vm1 = vweird.f32 %v1408_v39 }
 0x4fa   :  { %1409 = vrsqrt.f32 %v469_v40  ;;  %vm478_vm3 = vmor %vm476_vm2, %vm477_vm1  ;;  %vm486_vm5 = vweird.f32 %v469_v40 }
 0x4fb   :  { %v472_v42 = vmul.f32 %v1408_v39, %v471_v41 }
 0x4fd   :  { %v473_v43 = vmul.f32 0.5, %v472_v42 }
 0x4ff   :  { %v474_v45 = vsub.f32 1.5, %v473_v43 }
 0x500   :  { %v1410_v46 = vpop.eup %1409 }
 0x501   :  { %v475_v47 = vmul.f32 %v1408_v39, %v474_v45  ;;  %v481_v48 = vmul.f32 %v1410_v46, %v469_v40  ;;  %vm487_vm4 = vweird.f32 %v1410_v46  ;;  %v627_v40 = vld [vmem:[%s2146_s3 + $0x20] sm:$0xff]  ;;  %v626_v45 = vld [vmem:[%s2146_s3 + $0x18] sm:$0xff] }
 0x502   :  { %vm488_vm6 = vmor %vm486_vm5, %vm487_vm4 }
 0x503   :  { %v479_v50 = vsel %vm478_vm3, %v1408_v39, %v475_v47  ;;  %v482_v51 = vmul.f32 %v1410_v46, %v481_v48 }
 0x504   :  { %v490_v52 = vmul.f32 %v479_v50, %v456_v24 }
 0x505   :  { %v483_v54 = vmul.f32 0.5, %v482_v51 }
 0x506   :  { %v493_v55 = vmul.f32 %v492_v49, %v490_v52 }
 0x507   :  { %v484_v56 = vsub.f32 1.5, %v483_v54  ;;  %v624_v54 = vld [vmem:[%s2146_s3 + $0x8] sm:$0xff] }
 0x508   :  { %v496_v57 = vadd.f32 %v495_v53, %v493_v55 }
 0x509   :  { %v485_v58 = vmul.f32 %v1410_v46, %v484_v56 }
 0x50a   :  { %1317 = vmatmul.msk.f32.vlgmr.msra.gmra.mxu2 %vm67_vm0, %v496_v57 }
 0x50b   :  { %v489_v60 = vsel %vm488_vm6, %v1410_v46, %v485_v58  ;;  %v623_v58 = vld [vmem:[%s2146_s3] sm:$0xff] }
 0x50c   :  { %v491_v61 = vmul.f32 %v489_v60, %v457_v28  ;;  %v630_v28 = vld [vmem:[%s2146_s3 + $0x38] sm:$0xff] }
 0x50d   :  { %647 = vmatpush.msra.mxu0 %v630_v28 }
 0x50e   :  { %v494_v13 = vmul.f32 %v492_v49, %v491_v61  ;;  %v625_v49 = vld [vmem:[%s2146_s3 + $0x10] sm:$0xff] }
 0x50f   :  { %648 = vmatpush.msra.mxu0 %v629_v33 }
 0x510   :  { %v497_v20 = vadd.f32 %v495_v53, %v494_v13 }
 0x511   :  { %649 = vmatpush.msra.mxu0 %v628_v37 }
 0x512   :  { %1318 = vmatmul.msk.f32.gmra.mxu2 %vm67_vm0, %v497_v20 }
 0x513   :  { %650 = vmatpush.msra.mxu0 %v627_v40 }
 0x515   :  { %651 = vmatpush.msra.mxu0 %v626_v45 }
 0x517   :  { %652 = vmatpush.msra.mxu0 %v625_v49 }
 0x519   :  { %653 = vmatpush.msra.mxu0 %v624_v54 }
 0x51b   :  { %654 = vmatpush.msra.mxu0 %v623_v58 }
 0x58d   :  { %v529_v23 = vpop.f32.mrf.mxu2 }
 0x58e   :  { %v1863_v24 = vadd.f32 %v1391_v21, %v529_v23 }
 0x590   :  { %v1866_v0 = vmul.f32 0.70710677, %v1863_v24 }
 0x592   :  { %v539_v25 = vmul.f32 %v1866_v0, %v1866_v0 }
 0x594   :  { %v540_v26 = vmin.f32 %v539_v25, 16.0 }
 0x595   :  { %v532_v27 = vpop.f32.mrf.mxu2 }
 0x596   :  { %v541_v2 = vmul.f32 2.1237322e-06, %v540_v26  ;;  %v552_v29 = vmul.f32 3.8918573e-05, %v540_v26  ;;  %v1870_v30 = vadd.f32 %v1391_v21, %v532_v27 }
 0x598   :  { %v542_v31 = vadd.f32 0.00028619796, %v541_v2  ;;  %v553_v32 = vadd.f32 0.001143296, %v552_v29  ;;  %v1879_v34 = vmul.f32 0.70710677, %v1870_v30 }
 0x59a   :  { %v543_v35 = vmul.f32 %v542_v31, %v540_v26  ;;  %v554_v36 = vmul.f32 %v553_v32, %v540_v26  ;;  %v579_v38 = vmul.f32 %v1879_v34, %v1879_v34 }
 0x59c   :  { %v555_v39 = vadd.f32 0.014752088, %v554_v36  ;;  %v544_v41 = vadd.f32 0.0036580483, %v543_v35  ;;  %v580_v42 = vmin.f32 %v579_v38, 16.0 }
 0x59e   :  { %v556_v43 = vmul.f32 %v555_v39, %v540_v26  ;;  %v581_v46 = vmul.f32 2.1237322e-06, %v580_v42  ;;  %v592_v47 = vmul.f32 3.8918573e-05, %v580_v42  ;;  %v545_v50 = vmul.f32 %v544_v41, %v540_v26 }
 0x5a0   :  { %v557_v48 = vadd.f32 0.112945676, %v556_v43  ;;  %v582_v51 = vadd.f32 0.00028619796, %v581_v46  ;;  %v593_v52 = vadd.f32 0.001143296, %v592_v47 }
 0x5a1   :  { %v546_v60 = vadd.f32 0.05243302, %v545_v50 }
 0x5a2   :  { %v558_v53 = vmul.f32 %v557_v48, %v540_v26  ;;  %v583_v55 = vmul.f32 %v582_v51, %v580_v42  ;;  %v594_v56 = vmul.f32 %v593_v52, %v580_v42 }
 0x5a3   :  { %v547_v25 = vmul.f32 %v546_v60, %v540_v26 }
 0x5a4   :  { %v559_v57 = vadd.f32 0.4994258, %v558_v53  ;;  %v595_v61 = vadd.f32 0.014752088, %v594_v56  ;;  %v584_v20 = vadd.f32 0.0036580483, %v583_v55 }
 0x5a5   :  { %v548_v28 = vadd.f32 0.18741608, %v547_v25 }
 0x5a6   :  { %v560_v13 = vmul.f32 %v559_v57, %v540_v26  ;;  %v596_v21 = vmul.f32 %v595_v61, %v580_v42  ;;  %v585_v2 = vmul.f32 %v584_v20, %v580_v42  ;;  %v535_v20 = vmul.f32 0.5, %v1863_v24 }
 0x5a7   :  { %v549_v36 = vmul.f32 %v548_v28, %v540_v26 }
 0x5a8   :  { %v561_v23 = vadd.f32 1.0, %v560_v13  ;;  %v597_v27 = vadd.f32 0.112945676, %v596_v21  ;;  %v586_v32 = vadd.f32 0.05243302, %v585_v2 }
 0x5a9   :  { %v550_v43 = vadd.f32 1.1283791, %v549_v36 }
 0x5aa   :  { %1411 = vrcp.f32 %v561_v23  ;;  %v598_v29 = vmul.f32 %v597_v27, %v580_v42  ;;  %v587_v39 = vmul.f32 %v586_v32, %v580_v42  ;;  %v573_v41 = vand.u32 2147483648, %v561_v23 }
 0x5ab   :  { %v571_v46 = vand.u32 2147483647, %v561_v23  ;;  %vm567_vm8 = vweird.f32 %v561_v23  ;;  %v551_v51 = vmul.f32 %v550_v43, %v1866_v0 }
 0x5ac   :  { %v599_v31 = vadd.f32 0.4994258, %v598_v29  ;;  %v588_v47 = vadd.f32 0.18741608, %v587_v39  ;;  %v574_v49 = vor.u32 1.1754944e-38, %v573_v41 }
 0x5ad   :  { %vm572_vm10 = vcmp.eq.f32.partialorder %v571_v46, 8.507059e+37 }
 0x5ae   :  { %v600_v33 = vmul.f32 %v599_v31, %v580_v42  ;;  %v589_v53 = vmul.f32 %v588_v47, %v580_v42  ;;  %v536_v31 = vmul.f32 0.5, %v1870_v30 }
 0x5b0   :  { %v1412_v35 = vpop.eup %1411  ;;  %v601_v38 = vadd.f32 1.0, %v600_v33  ;;  %v590_v60 = vadd.f32 1.1283791, %v589_v53  ;;  %v631_v33 = vperm.slane %v1609_v44, 5  ;;  %v1326_v53 = vld [vmem:[%s2144_s1 + $0x90] sm:$0xff] }
 0x5b1   :  { %v563_v37 = vmul.f32 %v1412_v35, %v561_v23  ;;  %vm568_vm7 = vweird.f32 %v1412_v35 }
 0x5b2   :  { %1413 = vrcp.f32 %v601_v38  ;;  %vm569_vm9 = vmor %vm567_vm8, %vm568_vm7  ;;  %v613_v58 = vand.u32 2147483648, %v601_v38  ;;  %v611_v13 = vand.u32 2147483647, %v601_v38  ;;  %vm607_vm12 = vweird.f32 %v601_v38 }
 0x5b3   :  { %v564_v40 = vsub.f32 1.0, %v563_v37  ;;  %v591_v42 = vmul.f32 %v590_v60, %v1879_v34  ;;  %v1324_v60 = vld [vmem:[%s2144_s1 + $0x80] sm:$0xff] }
 0x5b4   :  { %v614_v25 = vor.u32 1.1754944e-38, %v613_v58  ;;  %vm612_vm15 = vcmp.eq.f32.partialorder %v611_v13, 8.507059e+37  ;;  %v1330_v58 = vld [vmem:[%s2144_s1 + $0xa0] sm:$0xff] }
 0x5b5   :  { %v565_v45 = vmul.f32 %v1412_v35, %v564_v40 }
 0x5b7   :  { %v566_v48 = vadd.f32 %v1412_v35, %v565_v45 }
 0x5b8   :  { %v1414_v50 = vpop.eup %1413 }
 0x5b9   :  { %v570_v52 = vsel %vm569_vm9, %v1412_v35, %v566_v48  ;;  %v603_v54 = vmul.f32 %v1414_v50, %v601_v38  ;;  %vm608_vm11 = vweird.f32 %v1414_v50 }
 0x5ba   :  { %v575_v26 = vsel %vm572_vm10, %v574_v49, %v570_v52  ;;  %vm609_vm14 = vmor %vm607_vm12, %vm608_vm11  ;;  %v1339_v52 = vld [vmem:[%s2144_s1 + $0xd8] sm:$0xff] }
 0x5bb   :  { %v576_v55 = vmul.f32 %v575_v26, %v551_v51  ;;  %v604_v56 = vsub.f32 1.0, %v603_v54  ;;  %v1327_v51 = vld [vmem:[%s2144_s1 + $0x98] sm:$0xff]  ;;  %v1332_v26 = vld [vmem:[%s2144_s1 + $0xb0] sm:$0xff]  ;;  %795 = vmatpush.msrb.mxu0 %v1339_v52 }
 0x5bc   :  { %739 = vmatpush.msrb.mxu1 %v1327_v51  ;;  %v1338_v54 = vld [vmem:[%s2144_s1 + $0xd0] sm:$0xff] }
 0x5bd   :  { %v1319_v57 = vclamps-f32 %v576_v55, 1.0  ;;  %v605_v61 = vmul.f32 %v1414_v50, %v604_v56  ;;  %v1331_v55 = vld [vmem:[%s2144_s1 + $0xa8] sm:$0xff]  ;;  %796 = vmatpush.msrb.mxu0 %v1338_v54 }
 0x5be   :  { %740 = vmatpush.msrb.mxu1 %v1326_v53  ;;  %v1325_v56 = vld [vmem:[%s2144_s1 + $0x88] sm:$0xff] }
 0x5bf   :  { %v619_v21 = vadd.f32 1.0, %v1319_v57  ;;  %v606_v23 = vadd.f32 %v1414_v50, %v605_v61  ;;  %v1337_v57 = vld [vmem:[%s2144_s1 + $0xc8] sm:$0xff]  ;;  %v1336_v61 = vld [vmem:[%s2144_s1 + $0xc0] sm:$0xff] }
 0x5c0   :  { %741 = vmatpush.msrb.mxu1 %v1325_v56  ;;  %797 = vmatpush.msrb.mxu0 %v1337_v57 }
 0x5c1   :  { %v621_v0 = vmul.f32 %v619_v21, %v535_v20  ;;  %v610_v27 = vsel %vm609_vm14, %v1414_v50, %v606_v23  ;;  %v1333_v50 = vld [vmem:[%s2144_s1 + $0xb8] sm:$0xff] }
 0x5c2   :  { %v615_v2 = vsel %vm612_vm15, %v614_v25, %v610_v27  ;;  %767 = vmatpush.msrb.mxu2 %v1333_v50  ;;  %742 = vmatpush.msrb.mxu1 %v1324_v60 }
 0x5c3   :  { %1321 = vmatmul.msk.f32.vlgmr.msra.gmra.mxu0 %vm632_vm13, %v621_v0  ;;  %v616_v29 = vmul.f32 %v615_v2, %v591_v42 }
 0x5c4   :  { %768 = vmatpush.msrb.mxu2 %v1332_v26  ;;  %798 = vmatpush.msrb.mxu0 %v1336_v61 }
 0x5c5   :  { %v1320_v28 = vclamps-f32 %v616_v29, 1.0 }
 0x5c6   :  { %769 = vmatpush.msrb.mxu2 %v1331_v55 }
 0x5c7   :  { %v620_v32 = vadd.f32 1.0, %v1320_v28 }
 0x5c8   :  { %770 = vmatpush.msrb.mxu2 %v1330_v58 }
 0x5c9   :  { %v622_v24 = vmul.f32 %v620_v32, %v536_v31  ;;  %v1969_v31 = vld [vmem:[%s2147_s4 + $0x8] sm:$0x3f] }
 0x5cb   :  { %1322 = vmatmul.msk.f32.gmra.mxu0 %vm632_vm13, %v622_v24 }
 0x640   :  { %v656_v35 = vpop.f32.mrf.mxu0 }
 0x641   :  { %v657_v36 = vadd.f32 %v656_v35, %v631_v33  ;;  %v710_v35 = vperm.slane %v1969_v31, 0 }
 0x643   :  { %v1909_v37 = vadd.f32 %v657_v36, %v1830_v59 }
 0x645   :  { %v666_v34 = vsel %vm67_vm0, %v1909_v37, 0.0 }
 0x646   :  { %667 = vadd.xlane.f32.xlu1 %v666_v34 }
 0x648   :  { %v659_v38 = vpop.f32.mrf.mxu0 }
 0x649   :  { %v660_v39 = vadd.f32 %v659_v38, %v631_v33 }
 0x64b   :  { %v1914_v40 = vadd.f32 %v660_v39, %v1835_v19  ;;  %v713_v39 = vperm.slane %v1969_v31, 1 }
 0x64d   :  { %v669_v30 = vsel %vm67_vm0, %v1914_v40, 0.0 }
 0x64e   :  { %670 = vadd.xlane.f32.xlu2 %v669_v30 }
 0x6b9   :  { %v668_v41 = vpop.xlane.xlu1 %667 }
 0x6ba   :  { %v672_v44 = vmul.f32 %v668_v41, %v1556_v10 }
 0x6bc   :  { %v674_v43 = vsub.f32 %v1909_v37, %v672_v44 }
 0x6be   :  { %v676_v59 = vmul.f32 %v674_v43, %v674_v43 }
 0x6c0   :  { %v678_v45 = vsel %vm67_vm0, %v676_v59, 0.0 }
 0x6c1   :  { %679 = vadd.xlane.f32.xlu0 %v678_v45  ;;  %v671_v46 = vpop.xlane.xlu2 %670 }
 0x6c2   :  { %v673_v47 = vmul.f32 %v671_v46, %v1556_v10 }
 0x6c4   :  { %v1923_v48 = vsub.f32 %v1914_v40, %v673_v47 }
 0x6c6   :  { %v677_v19 = vmul.f32 %v1923_v48, %v1923_v48 }
 0x6c8   :  { %v681_v49 = vsel %vm67_vm0, %v677_v19, 0.0 }
 0x6c9   :  { %682 = vadd.xlane.f32.xlu1 %v681_v49 }
 0x734   :  { %v680_v13 = vpop.xlane.xlu0 %679 }
 0x735   :  { %v684_v20 = vmul.f32 %v680_v13, %v1556_v10 }
 0x737   :  { %v686_v21 = vadd.f32 1e-05, %v684_v20 }
 0x739   :  { %1415 = vrsqrt.f32 %v686_v21  ;;  %vm694_vm2 = vweird.f32 %v686_v21 }
 0x73c   :  { %v683_v23 = vpop.xlane.xlu1 %682 }
 0x73d   :  { %v685_v0 = vmul.f32 %v683_v23, %v1556_v10 }
 0x73f   :  { %v1416_v25 = vpop.eup %1415  ;;  %v687_v27 = vadd.f32 1e-05, %v685_v0 }
 0x740   :  { %v689_v42 = vmul.f32 %v1416_v25, %v686_v21  ;;  %vm695_vm1 = vweird.f32 %v1416_v25 }
 0x741   :  { %1417 = vrsqrt.f32 %v687_v27  ;;  %vm696_vm3 = vmor %vm694_vm2, %vm695_vm1  ;;  %vm704_vm5 = vweird.f32 %v687_v27 }
 0x742   :  { %v690_v2 = vmul.f32 %v1416_v25, %v689_v42 }
 0x744   :  { %v691_v29 = vmul.f32 0.5, %v690_v2 }
 0x746   :  { %v692_v28 = vsub.f32 1.5, %v691_v29 }
 0x747   :  { %v1418_v32 = vpop.eup %1417 }
 0x748   :  { %v693_v24 = vmul.f32 %v1416_v25, %v692_v28  ;;  %v699_v33 = vmul.f32 %v1418_v32, %v687_v27  ;;  %vm705_vm4 = vweird.f32 %v1418_v32 }
 0x749   :  { %vm706_vm6 = vmor %vm704_vm5, %vm705_vm4 }
 0x74a   :  { %v697_v36 = vsel %vm696_vm3, %v1416_v25, %v693_v24  ;;  %v700_v38 = vmul.f32 %v1418_v32, %v699_v33 }
 0x74b   :  { %v708_v34 = vmul.f32 %v697_v36, %v674_v43 }
 0x74c   :  { %v701_v30 = vmul.f32 0.5, %v700_v38 }
 0x74d   :  { %v711_v41 = vmul.f32 %v710_v35, %v708_v34 }
 0x74e   :  { %v702_v44 = vsub.f32 1.5, %v701_v30 }
 0x74f   :  { %v714_v59 = vadd.f32 %v713_v39, %v711_v41  ;;  %v1363_v41 = vld [vmem:[%s2144_s1 + $0xf8] sm:$0xff] }
 0x750   :  { %v703_v45 = vmul.f32 %v1418_v32, %v702_v44  ;;  %1027 = vmatpush.msra.mxu0 %v1363_v41  ;;  %v1362_v44 = vld [vmem:[%s2144_s1 + $0xf0] sm:$0xff] }
 0x751   :  { %1328 = vmatmul.msk.f32.vlgmr.msrb.gmra.mxu1 %vm67_vm0, %v714_v59  ;;  %1334 = vmatmul.msk.f32.vlgmr.msrb.gmra.mxu2 %vm67_vm0, %v714_v59 }
 0x752   :  { %1340 = vmatmul.msk.f32.vlgmr.msrb.gmra.mxu0 %vm67_vm0, %v714_v59  ;;  %v707_v46 = vsel %vm706_vm6, %v1418_v32, %v703_v45 }
 0x753   :  { %v709_v43 = vmul.f32 %v707_v46, %v1923_v48  ;;  %1028 = vmatpush.msra.mxu0 %v1362_v44 }
 0x755   :  { %v712_v47 = vmul.f32 %v710_v35, %v709_v43 }
 0x757   :  { %v715_v19 = vadd.f32 %v713_v39, %v712_v47 }
 0x759   :  { %1329 = vmatmul.msk.f32.gmra.mxu1 %vm67_vm0, %v715_v19  ;;  %1335 = vmatmul.msk.f32.gmra.mxu2 %vm67_vm0, %v715_v19 }
 0x75a   :  { %1341 = vmatmul.msk.f32.gmra.mxu0 %vm67_vm0, %v715_v19 }
 0x7ce   :  { %v744_v32 = vpop.f32.mrf.mxu1 }
 0x7cf   :  { %v800_v49 = vpop.f32.mrf.mxu0 }
 0x7d0   :  { %v836_v26 = vmul.f32 %v800_v49, %v1629_v63  ;;  %v834_v55 = vmul.f32 %v800_v49, %v1641_v3  ;;  %v832_v58 = vmul.f32 %v800_v49, %v1653_v5  ;;  %v830_v61 = vmul.f32 %v800_v49, %v1665_v7 }
 0x7d1   :  { %v828_v20 = vmul.f32 %v800_v49, %v1677_v9  ;;  %v826_v23 = vmul.f32 %v800_v49, %v1689_v12  ;;  %v824_v25 = vmul.f32 %v800_v49, %v1703_v16  ;;  %v822_v27 = vmul.f32 %v800_v49, %v1715_v18 }
 0x7d4   :  { %v1980_v50 = vpop.f32.mrf.mxu2 }
 0x7d5   :  { %v820_v57 = vmul.f32 %v1980_v50, %v1629_v63  ;;  %v818_v63 = vmul.f32 %v1980_v50, %v1641_v3  ;;  %v816_v3 = vmul.f32 %v1980_v50, %v1653_v5  ;;  %v814_v2 = vmul.f32 %v1980_v50, %v1665_v7 }
 0x7d6   :  { %v812_v29 = vmul.f32 %v1980_v50, %v1677_v9  ;;  %v810_v28 = vmul.f32 %v1980_v50, %v1689_v12  ;;  %v747_v12 = vpop.f32.mrf.mxu1 }
 0x7d7   :  { %v803_v51 = vpop.f32.mrf.mxu0 }
 0x7d8   :  { %v837_v52 = vmul.f32 %v803_v51, %v1623_v62  ;;  %v835_v48 = vmul.f32 %v803_v51, %v1635_v1  ;;  %v833_v56 = vmul.f32 %v803_v51, %v1647_v4  ;;  %v831_v60 = vmul.f32 %v803_v51, %v1659_v6 }
 0x7d9   :  { %v829_v13 = vmul.f32 %v803_v51, %v1671_v8  ;;  %v827_v21 = vmul.f32 %v803_v51, %v1683_v11  ;;  %v825_v0 = vmul.f32 %v803_v51, %v1697_v15  ;;  %v823_v42 = vmul.f32 %v803_v51, %v1709_v17 }
 0x7da   :  { %927 = vmatpush.msra.mxu2 %v837_v52 }
 0x7dc   :  { %928 = vmatpush.msra.mxu2 %v836_v26  ;;  %v775_v53 = vpop.f32.mrf.mxu2 }
 0x7dd   :  { %v821_v54 = vmul.f32 %v775_v53, %v1623_v62  ;;  %v819_v62 = vmul.f32 %v775_v53, %v1635_v1  ;;  %v817_v1 = vmul.f32 %v775_v53, %v1647_v4  ;;  %v815_v4 = vmul.f32 %v775_v53, %v1659_v6 }
 0x7de   :  { %929 = vmatpush.msra.mxu2 %v835_v48  ;;  %v813_v5 = vmul.f32 %v775_v53, %v1671_v8  ;;  %v811_v6 = vmul.f32 %v775_v53, %v1683_v11  ;;  %v809_v7 = vmul.f32 %v775_v53, %v1697_v15  ;;  %v808_v8 = vmul.f32 %v1980_v50, %v1703_v16 }
 0x7df   :  { %1342 = vmatpush.xpose.msk.msra.mxu1 %vm67_vm0, %v821_v54  ;;  %v807_v9 = vmul.f32 %v775_v53, %v1709_v17  ;;  %v806_v11 = vmul.f32 %v1980_v50, %v1715_v18 }
 0x7e0   :  { %930 = vmatpush.msra.mxu2 %v834_v55 }
 0x7e2   :  { %931 = vmatpush.msra.mxu2 %v833_v56 }
 0x7e3   :  { %1343 = vmatpush.xpose.msk.msra.mxu1 %vm67_vm0, %v820_v57 }
 0x7e4   :  { %932 = vmatpush.msra.mxu2 %v832_v58 }
 0x7e6   :  { %933 = vmatpush.msra.mxu2 %v831_v60 }
 0x7e7   :  { %1344 = vmatpush.xpose.msk.msra.mxu1 %vm67_vm0, %v819_v62 }
 0x7e8   :  { %934 = vmatpush.msra.mxu2 %v830_v61 }
 0x7ea   :  { %935 = vmatpush.msra.mxu2 %v829_v13 }
 0x7eb   :  { %1345 = vmatpush.xpose.msk.msra.mxu1 %vm67_vm0, %v818_v63 }
 0x7ec   :  { %936 = vmatpush.msra.mxu2 %v828_v20 }
 0x7ee   :  { %937 = vmatpush.msra.mxu2 %v827_v21 }
 0x7ef   :  { %1346 = vmatpush.xpose.msk.msra.mxu1 %vm67_vm0, %v817_v1 }
 0x7f0   :  { %938 = vmatpush.msra.mxu2 %v826_v23  ;;  %v1008_v23 = vperm.slane %v1969_v31, 2 }
 0x7f2   :  { %939 = vmatpush.msra.mxu2 %v825_v0 }
 0x7f3   :  { %1347 = vmatpush.xpose.msk.msra.mxu1 %vm67_vm0, %v816_v3 }
 0x7f4   :  { %940 = vmatpush.msra.mxu2 %v824_v25 }
 0x7f6   :  { %941 = vmatpush.msra.mxu2 %v823_v42 }
 0x7f7   :  { %1348 = vmatpush.xpose.msk.msra.mxu1 %vm67_vm0, %v815_v4 }
 0x7f8   :  { %942 = vmatpush.msra.mxu2 %v822_v27 }
 0x7fb   :  { %1349 = vmatpush.xpose.msk.msra.mxu1 %vm67_vm0, %v814_v2 }
 0x7ff   :  { %1350 = vmatpush.xpose.msk.msra.mxu1 %vm67_vm0, %v813_v5 }
 0x803   :  { %1351 = vmatpush.xpose.msk.msra.mxu1 %vm67_vm0, %v812_v29 }
 0x807   :  { %1352 = vmatpush.xpose.msk.msra.mxu1 %vm67_vm0, %v811_v6 }
 0x80b   :  { %1353 = vmatpush.xpose.msk.msra.mxu1 %vm67_vm0, %v810_v28 }
 0x80f   :  { %1354 = vmatpush.xpose.msk.msra.mxu1 %vm67_vm0, %v809_v7 }
 0x813   :  { %1355 = vmatpush.xpose.msk.msra.mxu1 %vm67_vm0, %v808_v8 }
 0x817   :  { %1356 = vmatpush.xpose.msk.msra.mxu1 %vm67_vm0, %v807_v9 }
 0x81b   :  { %1357 = vmatpush.xpose.msk.msra.mxu1 %vm67_vm0, %v806_v11 }
 0x81e   :  { %1358 = vmatmul.msk.f32.vlgmr.msra.gmra.mxu1 %vm67_vm0, %v744_v32 }
 0x826   :  { %1359 = vmatmul.msk.f32.gmra.mxu1 %vm67_vm0, %v747_v12  ;;  %v1369_v12 = vld [vmem:[%s2145_s2 + $0x38] sm:$0xff] }
 0x89b   :  { %v909_v15 = vpop.f32.mrf.mxu1 }
 0x89c   :  { %915 = vmax.xlane.f32.xlu2 %v909_v15 }
 0x8a3   :  { %v912_v16 = vpop.f32.mrf.mxu1 }
 0x8a4   :  { %917 = vmax.xlane.f32.xlu0 %v912_v16 }
 0x90f   :  { %v916_v24 = vpop.xlane.xlu2 %915 }
 0x910   :  { %v919_v33 = vsub.f32 %v909_v15, %v916_v24  ;;  %v1368_v15 = vld [vmem:[%s2145_s2 + $0x30] sm:$0xff]  ;;  %v1366_v24 = vld [vmem:[%s2145_s2 + $0x20] sm:$0xff] }
 0x912   :  { %v921_v17 = vmul.f32 1.442695, %v919_v33 }
 0x914   :  { %1419 = vpow2.f32 %v921_v17 }
 0x917   :  { %v918_v35 = vpop.xlane.xlu0 %917 }
 0x918   :  { %v920_v36 = vsub.f32 %v912_v16, %v918_v35  ;;  %v1367_v16 = vld [vmem:[%s2145_s2 + $0x28] sm:$0xff] }
 0x91a   :  { %v1420_v34 = vpop.eup %1419  ;;  %v923_v18 = vmul.f32 1.442695, %v920_v36 }
 0x91b   :  { %v925_v38 = vmul.f32 %v1420_v34, %v1805_v14  ;;  %v1361_v14 = vld [vmem:[%s2144_s1 + $0xe8] sm:$0xff] }
 0x91c   :  { %1421 = vpow2.f32 %v923_v18  ;;  %1029 = vmatpush.msra.mxu0 %v1361_v14 }
 0x91d   :  { %943 = vmatmul.f32.vlgmr.msra.gmra.mxu2 %v925_v38  ;;  %966 = vmatmul.f32.vlgmr.msra.gmra.mxu3 %v925_v38 }
 0x922   :  { %v1422_v39 = vpop.eup %1421 }
 0x923   :  { %v926_v30 = vmul.f32 %v1422_v39, %v1811_v22  ;;  %v1360_v22 = vld [vmem:[%s2144_s1 + $0xe0] sm:$0xff]  ;;  %s1493_s1 = smov 8  }
 0x924   :  { %1030 = vmatpush.msra.mxu0 %v1360_v22 }
 0x925   :  { %946 = vmatmul.f32.gmra.mxu2 %v926_v30  ;;  %969 = vmatmul.f32.gmra.mxu3 %v926_v30 }
 0x926   :  { %1118 = vmatpush.msrb.mxu0 %v1369_v12 }
 0x928   :  { %1119 = vmatpush.msrb.mxu0 %v1368_v15 }
 0x92a   :  { %1120 = vmatpush.msrb.mxu0 %v1367_v16 }
 0x92c   :  { %1121 = vmatpush.msrb.mxu0 %v1366_v24  ;;  %v1375_v24 = vld [vmem:[%s2146_s3 + $0x48] sm:$0xff] }
 0x9a0   :  { %v967_v59 = vpop.f32.mrf.mxu3  ;;  %v944_v26 = vpop.f32.mrf.mxu2 }
 0x9a1   :  { %1423 = vrcp.f32 %v967_v59  ;;  %v984_v19 = vand.u32 2147483648, %v967_v59  ;;  %v982_v50 = vand.u32 2147483647, %v967_v59  ;;  %vm978_vm8 = vweird.f32 %v967_v59 }
 0x9a3   :  { %v985_v53 = vor.u32 1.1754944e-38, %v984_v19  ;;  %vm983_vm10 = vcmp.eq.f32.partialorder %v982_v50, 8.507059e+37 }
 0x9a7   :  { %v1424_v45 = vpop.eup %1423 }
 0x9a8   :  { %v974_v46 = vmul.f32 %v1424_v45, %v967_v59  ;;  %v970_v43 = vpop.f32.mrf.mxu3  ;;  %vm979_vm7 = vweird.f32 %v1424_v45  ;;  %v947_v20 = vpop.f32.mrf.mxu2 }
 0x9a9   :  { %1425 = vrcp.f32 %v970_v43  ;;  %vm980_vm9 = vmor %vm978_vm8, %vm979_vm7  ;;  %v999_v58 = vand.u32 2147483648, %v970_v43  ;;  %v997_v62 = vand.u32 2147483647, %v970_v43  ;;  %vm993_vm12 = vweird.f32 %v970_v43 }
 0x9aa   :  { %v975_v47 = vsub.f32 1.0, %v974_v46 }
 0x9ab   :  { %v1000_v13 = vor.u32 1.1754944e-38, %v999_v58  ;;  %vm998_vm15 = vcmp.eq.f32.partialorder %v997_v62, 8.507059e+37 }
 0x9ac   :  { %v976_v49 = vmul.f32 %v1424_v45, %v975_v47 }
 0x9ae   :  { %v977_v51 = vadd.f32 %v1424_v45, %v976_v49 }
 0x9af   :  { %v1426_v52 = vpop.eup %1425 }
 0x9b0   :  { %v981_v48 = vsel %vm980_vm9, %v1424_v45, %v977_v51  ;;  %v989_v54 = vmul.f32 %v1426_v52, %v970_v43  ;;  %vm994_vm11 = vweird.f32 %v1426_v52  ;;  %v1084_v45 = vperm.slane %v1969_v31, 3 }
 0x9b1   :  { %v986_v55 = vsel %vm983_vm10, %v985_v53, %v981_v48  ;;  %vm995_vm14 = vmor %vm993_vm12, %vm994_vm11 }
 0x9b2   :  { %v990_v56 = vsub.f32 1.0, %v989_v54  ;;  %v987_v57 = vmul.f32 %v986_v55, %v944_v26  ;;  %v1392_v55 = vld [vmem:[#allocation2 + $0x1] ss:$0 sm:$0xff] }
 0x9b4   :  { %v991_v60 = vmul.f32 %v1426_v52, %v990_v56  ;;  %1364 = vmatmul.msk.f32.vlgmr.msra.gmra.mxu0 %vm67_vm0, %v987_v57 }
 0x9b6   :  { %v992_v61 = vadd.f32 %v1426_v52, %v991_v60 }
 0x9b8   :  { %v996_v63 = vsel %vm995_vm14, %v1426_v52, %v992_v61 }
 0x9b9   :  { %v1001_v21 = vsel %vm998_vm15, %v1000_v13, %v996_v63  ;;  %v1381_v13 = vld [vmem:[%s2146_s3 + $0x78] sm:$0xff] }
 0x9ba   :  { %v1002_v1 = vmul.f32 %v1001_v21, %v947_v20  ;;  %1241 = vmatpush.msrb.mxu2 %v1381_v13 }
 0x9bc   :  { %1365 = vmatmul.msk.f32.gmra.mxu0 %vm67_vm0, %v1002_v1  ;;  %v1380_v1 = vld [vmem:[%s2146_s3 + $0x70] sm:$0xff] }
 0x9bd   :  { %1242 = vmatpush.msrb.mxu2 %v1380_v1 }
 0xa31   :  { %v1032_v0 = vpop.f32.mrf.mxu0 }
 0xa32   :  { %v1033_v3 = vadd.f32 %v1032_v0, %v1008_v23 }
 0xa34   :  { %v2058_v25 = vadd.f32 %v1033_v3, %v1909_v37 }
 0xa36   :  { %v1040_v42 = vsel %vm67_vm0, %v2058_v25, 0.0 }
 0xa37   :  { %1041 = vadd.xlane.f32.xlu1 %v1040_v42  ;;  %v1379_v42 = vld [vmem:[%s2146_s3 + $0x68] sm:$0xff] }
 0xa38   :  { %1243 = vmatpush.msrb.mxu2 %v1379_v42 }
 0xa39   :  { %v1035_v4 = vpop.f32.mrf.mxu0 }
 0xa3a   :  { %v1036_v27 = vadd.f32 %v1035_v4, %v1008_v23 }
 0xa3c   :  { %v2063_v2 = vadd.f32 %v1036_v27, %v1914_v40 }
 0xa3e   :  { %v1043_v5 = vsel %vm67_vm0, %v2063_v2, 0.0 }
 0xa3f   :  { %1044 = vadd.xlane.f32.xlu2 %v1043_v5 }
 0xaaa   :  { %v1042_v29 = vpop.xlane.xlu1 %1041 }
 0xaab   :  { %v1046_v6 = vmul.f32 %v1042_v29, %v1556_v10  ;;  %v1378_v29 = vld [vmem:[%s2146_s3 + $0x60] sm:$0xff] }
 0xaac   :  { %1244 = vmatpush.msrb.mxu2 %v1378_v29 }
 0xaad   :  { %v1048_v28 = vsub.f32 %v2058_v25, %v1046_v6 }
 0xaaf   :  { %v1050_v37 = vmul.f32 %v1048_v28, %v1048_v28 }
 0xab1   :  { %v1052_v7 = vsel %vm67_vm0, %v1050_v37, 0.0 }
 0xab2   :  { %1053 = vadd.xlane.f32.xlu0 %v1052_v7  ;;  %v1045_v8 = vpop.xlane.xlu2 %1044  ;;  %v1377_v7 = vld [vmem:[%s2146_s3 + $0x58] sm:$0xff] }
 0xab3   :  { %v1047_v9 = vmul.f32 %v1045_v8, %v1556_v10  ;;  %1245 = vmatpush.msrb.mxu2 %v1377_v7 }
 0xab5   :  { %v1049_v11 = vsub.f32 %v2063_v2, %v1047_v9 }
 0xab7   :  { %v1051_v40 = vmul.f32 %v1049_v11, %v1049_v11 }
 0xab9   :  { %v1055_v32 = vsel %vm67_vm0, %v1051_v40, 0.0  ;;  %v1376_v40 = vld [vmem:[%s2146_s3 + $0x50] sm:$0xff] }
 0xaba   :  { %1056 = vadd.xlane.f32.xlu1 %v1055_v32  ;;  %1246 = vmatpush.msrb.mxu2 %v1376_v40 }
 0xabc   :  { %1247 = vmatpush.msrb.mxu2 %v1375_v24 }
 0xb25   :  { %v1054_v33 = vpop.xlane.xlu0 %1053 }
 0xb26   :  { %v1058_v17 = vmul.f32 %v1054_v33, %v1556_v10 }
 0xb28   :  { %v1060_v35 = vadd.f32 1e-05, %v1058_v17 }
 0xb2a   :  { %1427 = vrsqrt.f32 %v1060_v35  ;;  %vm1068_vm2 = vweird.f32 %v1060_v35 }
 0xb2d   :  { %v1057_v36 = vpop.xlane.xlu1 %1056 }
 0xb2e   :  { %v1059_v34 = vmul.f32 %v1057_v36, %v1556_v10  ;;  %v1087_v10 = vperm.slane %v1969_v31, 4  ;;  %v1374_v36 = vld [vmem:[%s2146_s3 + $0x40] sm:$0xff]  ;;  %s1491_s3 = smov [#allocation5]  }
 0xb2f   :  { %1248 = vmatpush.msrb.mxu2 %v1374_v36  ;;  %s1264_s12 = sshll.u32 %s1491_s3, 4  ;;  %s1265_s12 = int_to_ptr.vmem [resolvable:$true] %s1264_s12 }
 0xb30   :  { %v1428_v18 = vpop.eup %1427  ;;  %v1061_v38 = vadd.f32 1e-05, %v1059_v34 }
 0xb31   :  { %v1063_v39 = vmul.f32 %v1428_v18, %v1060_v35  ;;  %vm1069_vm1 = vweird.f32 %v1428_v18 }
 0xb32   :  { %1429 = vrsqrt.f32 %v1061_v38  ;;  %vm1070_vm3 = vmor %vm1068_vm2, %vm1069_vm1  ;;  %vm1078_vm5 = vweird.f32 %v1061_v38 }
 0xb33   :  { %v1064_v30 = vmul.f32 %v1428_v18, %v1063_v39 }
 0xb35   :  { %v1065_v41 = vmul.f32 0.5, %v1064_v30 }
 0xb37   :  { %v1066_v44 = vsub.f32 1.5, %v1065_v41 }
 0xb38   :  { %v1430_v14 = vpop.eup %1429 }
 0xb39   :  { %v1067_v22 = vmul.f32 %v1428_v18, %v1066_v44  ;;  %v1073_v59 = vmul.f32 %v1430_v14, %v1061_v38  ;;  %vm1079_vm4 = vweird.f32 %v1430_v14 }
 0xb3a   :  { %vm1080_vm6 = vmor %vm1078_vm5, %vm1079_vm4 }
 0xb3b   :  { %v1071_v46 = vsel %vm1070_vm3, %v1428_v18, %v1067_v22  ;;  %v1074_v43 = vmul.f32 %v1430_v14, %v1073_v59 }
 0xb3c   :  { %v1082_v47 = vmul.f32 %v1071_v46, %v1048_v28 }
 0xb3d   :  { %v1075_v19 = vmul.f32 0.5, %v1074_v43 }
 0xb3e   :  { %v1085_v49 = vmul.f32 %v1084_v45, %v1082_v47 }
 0xb3f   :  { %v1076_v50 = vsub.f32 1.5, %v1075_v19 }
 0xb40   :  { %v1088_v51 = vadd.f32 %v1087_v10, %v1085_v49 }
 0xb41   :  { %v1077_v52 = vmul.f32 %v1430_v14, %v1076_v50 }
 0xb42   :  { %1370 = vmatmul.msk.f32.vlgmr.msrb.gmra.mxu0 %vm67_vm0, %v1088_v51 }
 0xb43   :  { %v1081_v26 = vsel %vm1080_vm6, %v1430_v14, %v1077_v52 }
 0xb44   :  { %v1083_v53 = vmul.f32 %v1081_v26, %v1049_v11 }
 0xb46   :  { %v1086_v48 = vmul.f32 %v1084_v45, %v1083_v53 }
 0xb48   :  { %v1089_v54 = vadd.f32 %v1087_v10, %v1086_v48 }
 0xb4a   :  { %1371 = vmatmul.msk.f32.gmra.mxu0 %vm67_vm0, %v1089_v54 }
 0xbbf   :  { %v1123_v56 = vpop.f32.mrf.mxu0 }
 0xbc0   :  { %v2091_v57 = vadd.f32 %v1392_v55, %v1123_v56 }
 0xbc2   :  { %v2094_v58 = vmul.f32 0.70710677, %v2091_v57 }
 0xbc4   :  { %v1133_v60 = vmul.f32 %v2094_v58, %v2094_v58 }
 0xbc6   :  { %v1134_v62 = vmin.f32 %v1133_v60, 16.0 }
 0xbc7   :  { %v1126_v61 = vpop.f32.mrf.mxu0 }
 0xbc8   :  { %v1135_v63 = vmul.f32 2.1237322e-06, %v1134_v62  ;;  %v1146_v20 = vmul.f32 3.8918573e-05, %v1134_v62  ;;  %v2101_v21 = vadd.f32 %v1392_v55, %v1126_v61 }
 0xbca   :  { %v1136_v23 = vadd.f32 0.00028619796, %v1135_v63  ;;  %v1147_v0 = vadd.f32 0.001143296, %v1146_v20  ;;  %v2107_v3 = vmul.f32 0.70710677, %v2101_v21 }
 0xbcc   :  { %v1137_v4 = vmul.f32 %v1136_v23, %v1134_v62  ;;  %v1148_v27 = vmul.f32 %v1147_v0, %v1134_v62  ;;  %v1173_v5 = vmul.f32 %v2107_v3, %v2107_v3 }
 0xbce   :  { %v1149_v6 = vadd.f32 0.014752088, %v1148_v27  ;;  %v1138_v28 = vadd.f32 0.0036580483, %v1137_v4  ;;  %v1174_v37 = vmin.f32 %v1173_v5, 16.0 }
 0xbd0   :  { %v1150_v8 = vmul.f32 %v1149_v6, %v1134_v62  ;;  %v1175_v9 = vmul.f32 2.1237322e-06, %v1174_v37  ;;  %v1186_v11 = vmul.f32 3.8918573e-05, %v1174_v37  ;;  %v1139_v12 = vmul.f32 %v1138_v28, %v1134_v62 }
 0xbd1   :  { %v1129_v28 = vmul.f32 0.5, %v2091_v57  ;;  %v1226_v57 = vperm.slane %v1969_v31, 5 }
 0xbd2   :  { %v1151_v32 = vadd.f32 0.112945676, %v1150_v8  ;;  %v1176_v15 = vadd.f32 0.00028619796, %v1175_v9  ;;  %v1187_v16 = vadd.f32 0.001143296, %v1186_v11 }
 0xbd3   :  { %v1140_v18 = vadd.f32 0.05243302, %v1139_v12 }
 0xbd4   :  { %v1152_v33 = vmul.f32 %v1151_v32, %v1134_v62  ;;  %v1177_v17 = vmul.f32 %v1176_v15, %v1174_v37  ;;  %v1188_v35 = vmul.f32 %v1187_v16, %v1174_v37  ;;  %v1130_v15 = vmul.f32 0.5, %v2101_v21 }
 0xbd5   :  { %v1141_v14 = vmul.f32 %v1140_v18, %v1134_v62 }
 0xbd6   :  { %v1153_v34 = vadd.f32 0.4994258, %v1152_v33  ;;  %v1189_v38 = vadd.f32 0.014752088, %v1188_v35  ;;  %v1178_v30 = vadd.f32 0.0036580483, %v1177_v17 }
 0xbd7   :  { %v1142_v46 = vadd.f32 0.18741608, %v1141_v14 }
 0xbd8   :  { %v1154_v39 = vmul.f32 %v1153_v34, %v1134_v62  ;;  %v1190_v41 = vmul.f32 %v1189_v38, %v1174_v37  ;;  %v1179_v59 = vmul.f32 %v1178_v30, %v1174_v37 }
 0xbd9   :  { %v1143_v49 = vmul.f32 %v1142_v46, %v1134_v62 }
 0xbda   :  { %v1155_v44 = vadd.f32 1.0, %v1154_v39  ;;  %v1191_v22 = vadd.f32 0.112945676, %v1190_v41  ;;  %v1180_v47 = vadd.f32 0.05243302, %v1179_v59 }
 0xbdb   :  { %v1144_v48 = vadd.f32 1.1283791, %v1143_v49 }
 0xbdc   :  { %1431 = vrcp.f32 %v1155_v44  ;;  %v1192_v45 = vmul.f32 %v1191_v22, %v1174_v37  ;;  %v1181_v52 = vmul.f32 %v1180_v47, %v1174_v37  ;;  %v1167_v53 = vand.u32 2147483648, %v1155_v44 }
 0xbdd   :  { %v1165_v55 = vand.u32 2147483647, %v1155_v44  ;;  %vm1161_vm8 = vweird.f32 %v1155_v44  ;;  %v1145_v63 = vmul.f32 %v1144_v48, %v2094_v58 }
 0xbde   :  { %v1193_v43 = vadd.f32 0.4994258, %v1192_v45  ;;  %v1182_v56 = vadd.f32 0.18741608, %v1181_v52  ;;  %v1168_v61 = vor.u32 1.1754944e-38, %v1167_v53 }
 0xbdf   :  { %vm1166_vm10 = vcmp.eq.f32.partialorder %v1165_v55, 8.507059e+37 }
 0xbe0   :  { %v1194_v10 = vmul.f32 %v1193_v43, %v1174_v37  ;;  %v1183_v1 = vmul.f32 %v1182_v56, %v1174_v37 }
 0xbe2   :  { %v1432_v19 = vpop.eup %1431  ;;  %v1195_v51 = vadd.f32 1.0, %v1194_v10  ;;  %v1184_v5 = vadd.f32 1.1283791, %v1183_v1 }
 0xbe3   :  { %v1157_v50 = vmul.f32 %v1432_v19, %v1155_v44  ;;  %vm1162_vm7 = vweird.f32 %v1432_v19 }
 0xbe4   :  { %1433 = vrcp.f32 %v1195_v51  ;;  %vm1163_vm9 = vmor %vm1161_vm8, %vm1162_vm7  ;;  %v1207_v27 = vand.u32 2147483648, %v1195_v51  ;;  %v1205_v6 = vand.u32 2147483647, %v1195_v51  ;;  %vm1201_vm12 = vweird.f32 %v1195_v51 }
 0xbe5   :  { %v1158_v26 = vsub.f32 1.0, %v1157_v50  ;;  %v1185_v11 = vmul.f32 %v1184_v5, %v2107_v3 }
 0xbe6   :  { %v1208_v58 = vor.u32 1.1754944e-38, %v1207_v27  ;;  %vm1206_vm15 = vcmp.eq.f32.partialorder %v1205_v6, 8.507059e+37 }
 0xbe7   :  { %v1159_v54 = vmul.f32 %v1432_v19, %v1158_v26 }
 0xbe9   :  { %v1160_v60 = vadd.f32 %v1432_v19, %v1159_v54 }
 0xbea   :  { %v1434_v13 = vpop.eup %1433 }
 0xbeb   :  { %v1164_v20 = vsel %vm1163_vm9, %v1432_v19, %v1160_v60  ;;  %v1197_v23 = vmul.f32 %v1434_v13, %v1195_v51  ;;  %vm1202_vm11 = vweird.f32 %v1434_v13 }
 0xbec   :  { %v1169_v62 = vsel %vm1166_vm10, %v1168_v61, %v1164_v20  ;;  %vm1203_vm14 = vmor %vm1201_vm12, %vm1202_vm11 }
 0xbed   :  { %v1170_v0 = vmul.f32 %v1169_v62, %v1145_v63  ;;  %v1198_v42 = vsub.f32 1.0, %v1197_v23 }
 0xbef   :  { %v1372_v4 = vclamps-f32 %v1170_v0, 1.0  ;;  %v1199_v29 = vmul.f32 %v1434_v13, %v1198_v42 }
 0xbf1   :  { %v1213_v7 = vadd.f32 1.0, %v1372_v4  ;;  %v1200_v8 = vadd.f32 %v1434_v13, %v1199_v29 }
 0xbf3   :  { %v1215_v9 = vmul.f32 %v1213_v7, %v1129_v28  ;;  %v1204_v37 = vsel %vm1203_vm14, %v1434_v13, %v1200_v8 }
 0xbf4   :  { %v1209_v40 = vsel %vm1206_vm15, %v1208_v58, %v1204_v37 }
 0xbf5   :  { %1382 = vmatmul.msk.f32.vlgmr.msrb.gmra.mxu2 %vm632_vm13, %v1215_v9  ;;  %v1210_v32 = vmul.f32 %v1209_v40, %v1185_v11 }
 0xbf7   :  { %v1373_v12 = vclamps-f32 %v1210_v32, 1.0 }
 0xbf9   :  { %v1214_v16 = vadd.f32 1.0, %v1373_v12 }
 0xbfb   :  { %v1216_v24 = vmul.f32 %v1214_v16, %v1130_v15 }
 0xbfd   :  { %1383 = vmatmul.msk.f32.gmra.mxu2 %vm632_vm13, %v1216_v24 }
 0xc78   :  { %v1250_v33 = vpop.f32.mrf.mxu2 }
 0xc79   :  { %v1251_v17 = vadd.f32 %v1250_v33, %v1226_v57 }
 0xc7b   :  { %v1256_v35 = vadd.f32 %v1251_v17, %v2058_v25 }
 0xc7d   :  { %1258 = vst.msk [vmem:[#allocation5] sm:$0xff] %vm67_vm0, %v1256_v35 }
 0xc80   :  { %v1253_v3 = vpop.f32.mrf.mxu2 }
 0xc81   :  { %v1254_v21 = vadd.f32 %v1253_v3, %v1226_v57 }
 0xc83   :  { %v1257_v36 = vadd.f32 %v1254_v21, %v2063_v2 }
 0xc85   :  { %1259 = vst.msk [vmem:[#allocation5 + $0x8] sm:$0xff] %vm67_vm0, %v1257_v36 }
 0xc86   :  { %1272 = dma.vmem_to_hbm [thread:$0]  %s1265_s12, 256, %s1267_s14, [#allocation4], %s1492_s0, %s1492_s0, %s1493_s1  }
 0xc87   :  { %1485 = dma.done.wait [#allocation4], 256  }
 0xc88   :  { %1486 = vsyncadd [#allocation4], 4294967040 }
 0xc89   :  { %1277 = vsyncpa [#allocation3], 1 }
 0xc8a   :  { %1278 = vsyncpa [#allocation4], 1 }

</bundles_post_ra>
